<compile_context>
chip_gen: v7x
topology: tpu7x:2x2x1
jax: 0.10.0
libtpu: 0.0.40
codegen_flags: <defaults>
</compile_context>

<pallas_src>
import functools

import jax
import jax.numpy as jnp
from jax.experimental import pallas as pl
from jax.experimental.pallas import tpu as pltpu


def _lexical_kernel(x_ref,
                    w1_ref, b1_ref,
                    w2_ref, b2_ref,
                    w3_ref, b3_ref,
                    w4_ref, b4_ref,
                    out_ref,
                    *, range_lo, range_hi):
    # In-kernel f32 -> bf16 cast: VPU slot has slack under the MXU, and the
    # kernel reads x from HBM exactly once (f32), no separate cast pass.
    x = x_ref[...].astype(jnp.bfloat16)                      # [TB, 768]

    # Layer 1: Linear(768->512) -> ReLU        (BN1 folded into W2/b2)
    h = jnp.dot(x, w1_ref[...], preferred_element_type=jnp.float32) + b1_ref[...]
    h = jnp.maximum(h, 0.0)

    # Layer 2: Linear(512->256) -> ReLU        (BN2 folded into W3/b3)
    h = jnp.dot(h.astype(jnp.bfloat16), w2_ref[...],
                preferred_element_type=jnp.float32) + b2_ref[...]
    h = jnp.maximum(h, 0.0)

    # Layer 3: Linear(256->128) -> ReLU
    h = jnp.dot(h.astype(jnp.bfloat16), w3_ref[...],
                preferred_element_type=jnp.float32) + b3_ref[...]
    h = jnp.maximum(h, 0.0)

    # Layer 4: Linear(128->1) as a VPU multiply + lane reduction (skip the MXU).
    y = jnp.sum(h * w4_ref[...], axis=-1) + b4_ref[0, 0]     # [TB]

    # _apply_activation with concept_range[0] >= 0: relu+clamp == clip(lo>=0, hi).
    y = jnp.clip(y, range_lo, range_hi)

    # Lane-dense store: one (1, TB) row per grid step -> full-width vst.
    out_ref[...] = y.reshape(1, -1).astype(out_ref.dtype)


def init_params(key, text_dim=768, dtype=jnp.float32):
    """Deterministic synthetic parameters (shapes match the nn.Module __init__)."""
    dims = [(text_dim, 512), (512, 256), (256, 128), (128, 1)]
    keys = jax.random.split(key, 16)
    p = {}
    ki = 0
    for li, (din, dout) in enumerate(dims, start=1):
        w = jax.random.normal(keys[ki], (din, dout), dtype) * (1.0 / jnp.sqrt(din)); ki += 1
        b = jax.random.normal(keys[ki], (1, dout), dtype) * 0.01; ki += 1
        p[f"w{li}"] = w
        p[f"b{li}"] = b
    # BatchNorm1d params for layers 1 (512) and 2 (256), folded (eval mode) into
    # a per-feature scale/shift pair.
    eps = 1e-5
    for li, feat in [(1, 512), (2, 256)]:
        gamma = 1.0 + 0.1 * jax.random.normal(keys[ki], (1, feat), dtype); ki += 1
        beta = 0.1 * jax.random.normal(keys[ki], (1, feat), dtype); ki += 1
        run_mean = 0.05 * jax.random.normal(keys[ki], (1, feat), dtype); ki += 1
        run_var = 1.0 + 0.1 * jnp.abs(jax.random.normal(keys[ki], (1, feat), dtype)); ki += 1
        scale = gamma / jnp.sqrt(run_var + eps)
        shift = beta - run_mean * scale
        p[f"s{li}"] = scale
        p[f"sh{li}"] = shift
    return p


def prepare_params(p):
    """Fold the BN affines into the following Linear layers (f32 math), then cast
    the matmul weights to bf16 for the MXU. Biases / w4 stay f32 (VPU adds)."""
    w1 = p["w1"]
    b1 = p["b1"]
    # BN1 (after ReLU1) folds into Linear2.
    w2 = p["w2"] * p["s1"].reshape(-1, 1)            # [512,256]
    b2 = p["b2"] + p["sh1"] @ p["w2"]                # [1,256]
    # BN2 (after ReLU2) folds into Linear3.
    w3 = p["w3"] * p["s2"].reshape(-1, 1)            # [256,128]
    b3 = p["b3"] + p["sh2"] @ p["w3"]                # [1,128]
    w4 = p["w4"].reshape(1, -1)                      # [1,128] row for lane reduce
    b4 = p["b4"].reshape(1, 1)                       # [1,1] scalar -> SMEM
    return {
        "w1": w1.astype(jnp.bfloat16), "b1": b1.astype(jnp.float32),
        "w2": w2.astype(jnp.bfloat16), "b2": b2.astype(jnp.float32),
        "w3": w3.astype(jnp.bfloat16), "b3": b3.astype(jnp.float32),
        "w4": w4.astype(jnp.float32),  "b4": b4.astype(jnp.float32),
    }


def _round_up(v: int, m: int) -> int:
    return ((v + m - 1) // m) * m


def lexical_richness_predictor(speech_features, text_features, folded_params,
                               concept_range=(0.0, 1.0), block_b=512):
    """Forward pass. speech_features [B,T,D] is unused (matches the PyTorch module)."""
    del speech_features  # not used by the reference forward
    assert concept_range[0] >= 0.0
    # TODO(synk): concept_range[0] < 0 (tanh rescale branch) not implemented here.

    B, D = text_features.shape
    fp = folded_params

    # Batch tile: multiple of 128 (lane-dense output blocks + clean bf16 packing).
    block_b = max(128, _round_up(block_b, 128))
    TB = max(128, min(block_b, _round_up(B, 128)))
    n_tiles = -(-B // TB)
    if n_tiles == 1 and B > 128:
        # v7x has 2 TensorCores: give the "parallel" batch axis >= 2 grid steps.
        TB = max(128, _round_up(-(-B // 2), 128))
        n_tiles = -(-B // TB)

    # No jnp.pad: if B % TB != 0 the trailing x block is a Pallas boundary block
    # (padded with unspecified values). Rows are independent, so the garbage rows
    # only produce garbage outputs past index B, which are sliced off below.
    kernel = functools.partial(_lexical_kernel,
                               range_lo=float(concept_range[0]),
                               range_hi=float(concept_range[1]))

    def const_spec(shape):
        # Constant index_map => block fetched once, stays VMEM-resident.
        return pl.BlockSpec(shape, lambda i: (0, 0))

    out = pl.pallas_call(
        kernel,
        # Lane-dense output: one (1, TB) row per tile, concatenated along lanes.
        out_shape=jax.ShapeDtypeStruct((1, n_tiles * TB), jnp.float32),
        grid=(n_tiles,),
        in_specs=[
            pl.BlockSpec((TB, D), lambda i: (i, 0)),      # x tile (f32, pipelined)
            const_spec(fp["w1"].shape), const_spec(fp["b1"].shape),
            const_spec(fp["w2"].shape), const_spec(fp["b2"].shape),
            const_spec(fp["w3"].shape), const_spec(fp["b3"].shape),
            const_spec(fp["w4"].shape),
            pl.BlockSpec(memory_space=pltpu.MemorySpace.SMEM),   # b4 scalar
        ],
        out_specs=pl.BlockSpec((1, TB), lambda i: (0, i)),
        compiler_params=pltpu.CompilerParams(
            dimension_semantics=("parallel",),
            # Footprint at TB<=512 is a few MB (fits v5e's 16 MiB scoped default);
            # only raise the limit if a bigger tile is requested.
            vmem_limit_bytes=(64 << 20) if TB > 512 else None),
    )(text_features,
      fp["w1"], fp["b1"],
      fp["w2"], fp["b2"],
      fp["w3"], fp["b3"],
      fp["w4"], fp["b4"])

    return out.reshape(-1)[:B].reshape(B, 1)


def _reference_forward(text_features, params, concept_range=(0.0, 1.0)):
    """Pure-JAX f32 reference with the original (unfolded) structure."""
    h = jnp.maximum(text_features @ params["w1"] + params["b1"], 0.0)
    h = h * params["s1"] + params["sh1"]
    h = jnp.maximum(h @ params["w2"] + params["b2"], 0.0)
    h = h * params["s2"] + params["sh2"]
    h = jnp.maximum(h @ params["w3"] + params["b3"], 0.0)
    y = h @ params["w4"] + params["b4"]
    y = jnp.maximum(y, 0.0)
    return jnp.clip(y, concept_range[0], concept_range[1])


if __name__ == "__main__":
    key = jax.random.PRNGKey(0)
    k_param, k_speech, k_text = jax.random.split(key, 3)

    B, T, D = 2, 8, 768  # text_dim is fixed at 768 by the module
    raw_params = init_params(k_param, text_dim=D)
    folded = prepare_params(raw_params)

    speech_features = jax.random.normal(k_speech, (B, T, D), jnp.float32)
    text_features = jax.random.normal(k_text, (B, D), jnp.float32)

    out = lexical_richness_predictor(speech_features, text_features, folded)
    out = jax.block_until_ready(out)

    ref = _reference_forward(text_features, raw_params)
    assert out.shape == (B, 1), out.shape
    # bf16 weights/activations => loosened tolerance vs. the f32 reference.
    assert jnp.allclose(out, ref, atol=5e-2, rtol=5e-2), (out, ref)

    print("KERNEL_OK")
</pallas_src>

<mosaic_0001>
module attributes {stable_mosaic.version = 11 : i64} {
  func.func @_lexical_kernel(%arg0: i32, %arg1: memref<128x768xf32, #tpu.memory_space<vmem>>, %arg2: memref<768x512xbf16, #tpu.memory_space<vmem>>, %arg3: memref<1x512xf32, #tpu.memory_space<vmem>>, %arg4: memref<512x256xbf16, #tpu.memory_space<vmem>>, %arg5: memref<1x256xf32, #tpu.memory_space<vmem>>, %arg6: memref<256x128xbf16, #tpu.memory_space<vmem>>, %arg7: memref<1x128xf32, #tpu.memory_space<vmem>>, %arg8: memref<1x128xf32, #tpu.memory_space<vmem>>, %arg9: memref<1x1xf32, #tpu.memory_space<smem>>, %arg10: memref<1x128xf32, #tpu.memory_space<vmem>>) attributes {dimension_semantics = [#tpu.dimension_semantics<parallel>], iteration_bounds = array<i64: 1>, scalar_prefetch = 0 : i64, scratch_operands = 0 : i64, tpu.core_type = #tpu.core_type<tc>, window_params = [{transform_indices = @transform_0, window_bounds = array<i64: 128, 768>}, {pipeline_mode = #tpu.pipeline_mode<synchronous>, transform_indices = @transform_1, window_bounds = array<i64: 768, 512>}, {pipeline_mode = #tpu.pipeline_mode<synchronous>, transform_indices = @transform_2, window_bounds = array<i64: 1, 512>}, {pipeline_mode = #tpu.pipeline_mode<synchronous>, transform_indices = @transform_3, window_bounds = array<i64: 512, 256>}, {pipeline_mode = #tpu.pipeline_mode<synchronous>, transform_indices = @transform_4, window_bounds = array<i64: 1, 256>}, {pipeline_mode = #tpu.pipeline_mode<synchronous>, transform_indices = @transform_5, window_bounds = array<i64: 256, 128>}, {pipeline_mode = #tpu.pipeline_mode<synchronous>, transform_indices = @transform_6, window_bounds = array<i64: 1, 128>}, {pipeline_mode = #tpu.pipeline_mode<synchronous>, transform_indices = @transform_7, window_bounds = array<i64: 1, 128>}, {transform_indices = @transform_8, window_bounds = array<i64: 1, 1>}, {transform_indices = @transform_9, window_bounds = array<i64: 1, 128>}]} {
    %c0 = arith.constant 0 : index
    %c0_0 = arith.constant 0 : index
    %0 = vector.load %arg1[%c0, %c0_0] : memref<128x768xf32, #tpu.memory_space<vmem>>, vector<128x768xf32>
    %1 = arith.truncf %0 : vector<128x768xf32> to vector<128x768xbf16>
    %c0_1 = arith.constant 0 : index
    %c0_2 = arith.constant 0 : index
    %2 = vector.load %arg2[%c0_1, %c0_2] : memref<768x512xbf16, #tpu.memory_space<vmem>>, vector<768x512xbf16>
    %cst = arith.constant dense<0.000000e+00> : vector<128x512xf32>
    %3 = tpu.matmul %1, %2, %cst {dimension_numbers = #tpu.dot_dimension_numbers<[1], [0], [0], [1], [0, 0, 1, 1], [], []>} : vector<128x768xbf16>, vector<768x512xbf16>, vector<128x512xf32> -> vector<128x512xf32>
    %c0_3 = arith.constant 0 : index
    %c0_4 = arith.constant 0 : index
    %4 = vector.load %arg3[%c0_3, %c0_4] : memref<1x512xf32, #tpu.memory_space<vmem>>, vector<1x512xf32>
    %5 = vector.broadcast %4 : vector<1x512xf32> to vector<128x512xf32>
    %6 = arith.addf %3, %5 : vector<128x512xf32>
    %cst_5 = arith.constant 0.000000e+00 : f32
    %7 = vector.broadcast %cst_5 : f32 to vector<128x512xf32>
    %8 = arith.maximumf %6, %7 : vector<128x512xf32>
    %9 = arith.truncf %8 : vector<128x512xf32> to vector<128x512xbf16>
    %c0_6 = arith.constant 0 : index
    %c0_7 = arith.constant 0 : index
    %10 = vector.load %arg4[%c0_6, %c0_7] : memref<512x256xbf16, #tpu.memory_space<vmem>>, vector<512x256xbf16>
    %cst_8 = arith.constant dense<0.000000e+00> : vector<128x256xf32>
    %11 = tpu.matmul %9, %10, %cst_8 {dimension_numbers = #tpu.dot_dimension_numbers<[1], [0], [0], [1], [0, 0, 1, 1], [], []>} : vector<128x512xbf16>, vector<512x256xbf16>, vector<128x256xf32> -> vector<128x256xf32>
    %c0_9 = arith.constant 0 : index
    %c0_10 = arith.constant 0 : index
    %12 = vector.load %arg5[%c0_9, %c0_10] : memref<1x256xf32, #tpu.memory_space<vmem>>, vector<1x256xf32>
    %13 = vector.broadcast %12 : vector<1x256xf32> to vector<128x256xf32>
    %14 = arith.addf %11, %13 : vector<128x256xf32>
    %cst_11 = arith.constant 0.000000e+00 : f32
    %15 = vector.broadcast %cst_11 : f32 to vector<128x256xf32>
    %16 = arith.maximumf %14, %15 : vector<128x256xf32>
    %17 = arith.truncf %16 : vector<128x256xf32> to vector<128x256xbf16>
    %c0_12 = arith.constant 0 : index
    %c0_13 = arith.constant 0 : index
    %18 = vector.load %arg6[%c0_12, %c0_13] : memref<256x128xbf16, #tpu.memory_space<vmem>>, vector<256x128xbf16>
    %cst_14 = arith.constant dense<0.000000e+00> : vector<128x128xf32>
    %19 = tpu.matmul %17, %18, %cst_14 {dimension_numbers = #tpu.dot_dimension_numbers<[1], [0], [0], [1], [0, 0, 1, 1], [], []>} : vector<128x256xbf16>, vector<256x128xbf16>, vector<128x128xf32> -> vector<128x128xf32>
    %c0_15 = arith.constant 0 : index
    %c0_16 = arith.constant 0 : index
    %20 = vector.load %arg7[%c0_15, %c0_16] : memref<1x128xf32, #tpu.memory_space<vmem>>, vector<1x128xf32>
    %21 = vector.broadcast %20 : vector<1x128xf32> to vector<128x128xf32>
    %22 = arith.addf %19, %21 : vector<128x128xf32>
    %cst_17 = arith.constant 0.000000e+00 : f32
    %23 = vector.broadcast %cst_17 : f32 to vector<128x128xf32>
    %24 = arith.maximumf %22, %23 : vector<128x128xf32>
    %c0_18 = arith.constant 0 : index
    %c0_19 = arith.constant 0 : index
    %25 = vector.load %arg8[%c0_18, %c0_19] : memref<1x128xf32, #tpu.memory_space<vmem>>, vector<1x128xf32>
    %26 = vector.broadcast %25 : vector<1x128xf32> to vector<128x128xf32>
    %27 = arith.mulf %24, %26 : vector<128x128xf32>
    %cst_20 = arith.constant dense<0.000000e+00> : vector<128xf32>
    %28 = vector.multi_reduction <add>, %27, %cst_20 [1] : vector<128x128xf32> to vector<128xf32>
    %c0_21 = arith.constant 0 : index
    %c0_22 = arith.constant 0 : index
    %29 = memref.load %arg9[%c0_21, %c0_22] : memref<1x1xf32, #tpu.memory_space<smem>>
    %30 = vector.broadcast %29 : f32 to vector<128xf32>
    %31 = arith.addf %28, %30 : vector<128xf32>
    %cst_23 = arith.constant 0.000000e+00 : f32
    %cst_24 = arith.constant 1.000000e+00 : f32
    %32 = vector.broadcast %cst_23 : f32 to vector<128xf32>
    %33 = arith.maximumf %32, %31 : vector<128xf32>
    %34 = vector.broadcast %cst_24 : f32 to vector<128xf32>
    %35 = arith.minimumf %34, %33 : vector<128xf32>
    %36 = vector.shape_cast %35 : vector<128xf32> to vector<1x128xf32>
    %c0_25 = arith.constant 0 : index
    %c0_26 = arith.constant 0 : index
    %37 = vector.load %arg10[%c0_25, %c0_26] : memref<1x128xf32, #tpu.memory_space<vmem>>, vector<1x128xf32>
    tpu.vector_store %arg10[%c0_25, %c0_26], %36 {strides = array<i32>} : memref<1x128xf32, #tpu.memory_space<vmem>>, vector<1x128xf32>,
    return
  }
  func.func @transform_0(%arg0: i32) -> (i32, i32) {
    %c0_i32 = arith.constant 0 : i32
    %c0_i32_0 = arith.constant 0 : i32
    return %arg0, %c0_i32 : i32, i32
  }
  func.func @transform_1(%arg0: i32) -> (i32, i32) {
    %c0_i32 = arith.constant 0 : i32
    %c0_i32_0 = arith.constant 0 : i32
    %c0_i32_1 = arith.constant 0 : i32
    return %c0_i32, %c0_i32_0 : i32, i32
  }
  func.func @transform_2(%arg0: i32) -> (i32, i32) {
    %c0_i32 = arith.constant 0 : i32
    %c0_i32_0 = arith.constant 0 : i32
    %c0_i32_1 = arith.constant 0 : i32
    return %c0_i32, %c0_i32_0 : i32, i32
  }
  func.func @transform_3(%arg0: i32) -> (i32, i32) {
    %c0_i32 = arith.constant 0 : i32
    %c0_i32_0 = arith.constant 0 : i32
    %c0_i32_1 = arith.constant 0 : i32
    return %c0_i32, %c0_i32_0 : i32, i32
  }
  func.func @transform_4(%arg0: i32) -> (i32, i32) {
    %c0_i32 = arith.constant 0 : i32
    %c0_i32_0 = arith.constant 0 : i32
    %c0_i32_1 = arith.constant 0 : i32
    return %c0_i32, %c0_i32_0 : i32, i32
  }
  func.func @transform_5(%arg0: i32) -> (i32, i32) {
    %c0_i32 = arith.constant 0 : i32
    %c0_i32_0 = arith.constant 0 : i32
    %c0_i32_1 = arith.constant 0 : i32
    return %c0_i32, %c0_i32_0 : i32, i32
  }
  func.func @transform_6(%arg0: i32) -> (i32, i32) {
    %c0_i32 = arith.constant 0 : i32
    %c0_i32_0 = arith.constant 0 : i32
    %c0_i32_1 = arith.constant 0 : i32
    return %c0_i32, %c0_i32_0 : i32, i32
  }
  func.func @transform_7(%arg0: i32) -> (i32, i32) {
    %c0_i32 = arith.constant 0 : i32
    %c0_i32_0 = arith.constant 0 : i32
    %c0_i32_1 = arith.constant 0 : i32
    return %c0_i32, %c0_i32_0 : i32, i32
  }
  func.func @transform_8(%arg0: i32) -> (i32, i32) {
    %c0_i32 = arith.constant 0 : i32
    %c0_i32_0 = arith.constant 0 : i32
    %c0_i32_1 = arith.constant 0 : i32
    return %c0_i32, %c0_i32_0 : i32, i32
  }
  func.func @transform_9(%arg0: i32) -> (i32, i32) {
    %c0_i32 = arith.constant 0 : i32
    %c0_i32_0 = arith.constant 0 : i32
    return %c0_i32, %arg0 : i32, i32
  }
}

</mosaic_0001>

<bundles_post_ra>
// kernel: tpu_custom_call.1
= control target key start
LH: loop header
LB: loop body
LE: loop exit
PB: predicated region body
PF: predicated region fallthrough
CT: control target
= control target key end

     0   :  { %15 = vsyncpa [#allocation4], 0  ;;  %s6414_s0 = inlined_call_operand.hbm [shape: f32[2,768], index: 0, kind: input, shape index: {}]   ;;  %s6415_s1 = inlined_call_operand.hbm [shape: bf16[768,512], index: 1, kind: input, shape index: {}]   ;;  %s6416_s2 = inlined_call_operand.vmem [shape: f32[1,512], index: 2, kind: input, shape index: {}]   ;;  %s6417_s3 = inlined_call_operand.hbm [shape: bf16[512,256], index: 3, kind: input, shape index: {}]   ;;  %s6418_s4 = inlined_call_operand.vmem [shape: f32[1,256], index: 4, kind: input, shape index: {}]   ;;  %s6419_s5 = inlined_call_operand.hbm [shape: bf16[256,128], index: 5, kind: input, shape index: {}]   ;;  %s6420_s6 = inlined_call_operand.vmem [shape: f32[1,128], index: 6, kind: input, shape index: {}]   ;;  %s6421_s7 = inlined_call_operand.vmem [shape: f32[1,128], index: 7, kind: input, shape index: {}]   ;;  %s6422_s8 = inlined_call_operand.<no memory space> [shape: f32[1,1], index: 8, kind: input, shape index: {}]   ;;  %s6423_s9 = inlined_call_operand.hbm [shape: f32[1,128], index: 9, kind: output, shape index: {}]  }
   0x1   :  { %16 = vsyncpa [#allocation7], 0 }
   0x2   :  { %17 = vsyncpa [#allocation10], 0 }
   0x3   :  { %18 = vsyncpa [#allocation5], 0 }
   0x4   :  { %23 = vsyncadd [#allocation4], 12096  ;;  %s5757_s30 = smov [#allocation6]   ;;  %s5639_s13 = scalar_lea.hbm %s6415_s1, 24576 }
   0x5   :  { %s36_s10 = sshll.u32 %s5757_s30, 4  ;;  %p5640_p0 = scmp.ne.s32.totalorder %s6415_s1, %s5639_s13  ;;  %s37_s10 = int_to_ptr.vmem [resolvable:$true] %s36_s10 }
   0x6   :  { %p5643_p1 = scmp.lt.u32.totalorder %s5639_s13, %s6415_s1 }
   0x8   :  { %p5645_p2 = pnand %p5643_p1, %p5640_p0 }
   0xa   :  { %5648 = shalt.err (!%p5645_p2)
}
   0xb   :  { %s5649_s18 = scalar_lea.vmem %s37_s10, 24576  ;;  %p5654_p4 = scmp.lt.s32.totalorder %s37_s10, %s37_s10 }
   0xc   :  { %p5650_p3 = scmp.ne.s32.totalorder %s37_s10, %s5649_s18  ;;  %p5655_p5 = scmp.lt.s32.totalorder %s5649_s18, %s5649_s18 }
   0xe   :  { %p5656_p6 = por %p5655_p5, %p5654_p4 }
  0x10   :  { %p5657_p7 = pnand %p5656_p6, %p5650_p3 }
  0x12   :  { %5660 = shalt.err (!%p5657_p7)
}
  0x13   :  { %s5758_s19 = smov 256   ;;  %s5759_s20 = smov 16  }
  0x14   :  { %42 = dma.hbm_to_vmem [thread:$0]  %s6415_s1, 24576, %s37_s10, [#allocation7], %s5758_s19, %s5758_s19, %s5759_s20  }
  0x15   :  { %s5760_s23 = smov [#allocation3]   ;;  %s5661_s27 = scalar_lea.hbm %s6414_s0, 192 }
  0x16   :  { %s24_s24 = sshll.u32 %s5760_s23, 4  ;;  %p5662_p8 = scmp.ne.s32.totalorder %s6414_s0, %s5661_s27  ;;  %s25_s24 = int_to_ptr.vmem [resolvable:$true] %s24_s24 }
  0x17   :  { %p5665_p9 = scmp.lt.u32.totalorder %s5661_s27, %s6414_s0 }
  0x19   :  { %p5667_p10 = pnand %p5665_p9, %p5662_p8 }
  0x1b   :  { %5670 = shalt.err (!%p5667_p10)
}
  0x1c   :  { %s5671_s12 = scalar_lea.vmem %s25_s24, 192  ;;  %s5675_s1 = scalar_lea.vmem %s25_s24, 12288 }
  0x1d   :  { %p5672_p11 = scmp.ne.s32.totalorder %s25_s24, %s5671_s12  ;;  %p5676_p12 = scmp.lt.s32.totalorder %s25_s24, %s25_s24 }
  0x1e   :  { %p5677_p13 = scmp.lt.s32.totalorder %s5675_s1, %s5671_s12 }
  0x20   :  { %p5678_p0 = por %p5677_p13, %p5676_p12 }
  0x22   :  { %p5679_p1 = pnand %p5678_p0, %p5672_p11 }
  0x24   :  { %5682 = shalt.err (!%p5679_p1)
}
  0x25   :  { %s5761_s10 = smov 192   ;;  %s5762_s13 = smov 12  }
  0x26   :  { %30 = dma.hbm_to_vmem [thread:$0]  %s6414_s0, 192, %s25_s24, [#allocation4], %s5761_s10, %s5761_s10, %s5762_s13  }
  0x27   :  { %s5763_s16 = smov [#allocation8]   ;;  %s5683_s20 = scalar_lea.hbm %s6417_s3, 8192 }
  0x28   :  { %s50_s17 = sshll.u32 %s5763_s16, 4  ;;  %p5684_p2 = scmp.ne.s32.totalorder %s6417_s3, %s5683_s20  ;;  %s51_s17 = int_to_ptr.vmem [resolvable:$true] %s50_s17 }
  0x29   :  { %p5687_p3 = scmp.lt.u32.totalorder %s5683_s20, %s6417_s3 }
  0x2b   :  { %p5689_p4 = pnand %p5687_p3, %p5684_p2 }
  0x2d   :  { %5692 = shalt.err (!%p5689_p4)
}
  0x2e   :  { %s5693_s26 = scalar_lea.vmem %s51_s17, 8192  ;;  %p5698_p6 = scmp.lt.s32.totalorder %s51_s17, %s51_s17 }
  0x2f   :  { %p5694_p5 = scmp.ne.s32.totalorder %s51_s17, %s5693_s26  ;;  %p5699_p7 = scmp.lt.s32.totalorder %s5693_s26, %s5693_s26 }
  0x31   :  { %p5700_p8 = por %p5699_p7, %p5698_p6 }
  0x33   :  { %p5701_p9 = pnand %p5700_p8, %p5694_p5 }
  0x35   :  { %5704 = shalt.err (!%p5701_p9)
}
  0x36   :  { %s5764_s0 = smov 128   ;;  %s5765_s24 = smov 8  }
  0x37   :  { %56 = dma.hbm_to_vmem [thread:$0]  %s6417_s3, 8192, %s51_s17, [#allocation7], %s5764_s0, %s5764_s0, %s5765_s24  }
  0x38   :  { %s5766_s29 = smov [#allocation9]   ;;  %s5705_s1 = scalar_lea.hbm %s6419_s5, 2048 }
  0x39   :  { %s64_s30 = sshll.u32 %s5766_s29, 4  ;;  %p5706_p10 = scmp.ne.s32.totalorder %s6419_s5, %s5705_s1  ;;  %s65_s30 = int_to_ptr.vmem [resolvable:$true] %s64_s30 }
  0x3a   :  { %p5709_p11 = scmp.lt.u32.totalorder %s5705_s1, %s6419_s5 }
  0x3c   :  { %p5711_p12 = pnand %p5709_p11, %p5706_p10 }
  0x3e   :  { %5714 = shalt.err (!%p5711_p12)
}
  0x3f   :  { %s5715_s16 = scalar_lea.vmem %s65_s30, 2048  ;;  %p5720_p0 = scmp.lt.s32.totalorder %s65_s30, %s65_s30 }
  0x40   :  { %p5716_p13 = scmp.ne.s32.totalorder %s65_s30, %s5715_s16  ;;  %p5721_p1 = scmp.lt.s32.totalorder %s5715_s16, %s5715_s16 }
  0x42   :  { %p5722_p2 = por %p5721_p1, %p5720_p0 }
  0x44   :  { %p5723_p3 = pnand %p5722_p2, %p5716_p13 }
  0x46   :  { %5726 = shalt.err (!%p5723_p3)
}
  0x47   :  { %s5767_s3 = smov 64   ;;  %s5768_s17 = smov 4  }
  0x48   :  { %70 = dma.hbm_to_vmem [thread:$0]  %s6419_s5, 2048, %s65_s30, [#allocation10], %s5767_s3, %s5767_s3, %s5768_s17  }
  0x49   :  { %5749 = dma.done.wait [#allocation4], 12288  }
  0x4a   :  { %5750 = vsyncadd [#allocation4], 4294955008 }
  0x4b   :  { %5751 = dma.done.wait [#allocation7], 32768  }
  0x4c   :  { %5752 = vsyncadd [#allocation7], 4294934528 }
  0x4d   :  { %5753 = dma.done.wait [#allocation10], 2048  }
  0x4e   :  { %5754 = vsyncadd [#allocation10], 4294965248  ;;  %v5111_v0 = vld [vmem:[#allocation6 + $0x4] ss:$16 sps:$4 sm:$0xff]   ;;  %v5113_v1 = vld [vmem:[#allocation6 + $0xc] ss:$16 sps:$4 sm:$0xff]   ;;  %v353_v41 = vlaneseq }
  0x4f   :  { %2528 = vmatprep.subr.bf16.mxu0 %v5111_v0  ;;  %v5115_v2 = vld [vmem:[#allocation6] ss:$16 sps:$4 sm:$0xff]   ;;  %v5116_v3 = vld [vmem:[#allocation6 + $0x8] ss:$16 sps:$4 sm:$0xff]   ;;  %2867 = vmatprep.subr.bf16.mxu1 %v5113_v1  ;;  %v5117_v4 = vld [vmem:[#allocation6 + $0x24] ss:$16 sps:$4 sm:$0xff]  }
  0x50   :  { %2529 = vmatpush1.bf16.msra.mxu0 %v5115_v2  ;;  %2868 = vmatpush1.bf16.msra.mxu1 %v5116_v3  ;;  %v5119_v5 = vld [vmem:[#allocation6 + $0x2c] ss:$16 sps:$4 sm:$0xff]   ;;  %v5121_v6 = vld [vmem:[#allocation6 + $0x20] ss:$16 sps:$4 sm:$0xff]   ;;  %v5122_v7 = vld [vmem:[#allocation6 + $0x28] ss:$16 sps:$4 sm:$0xff]  }
  0x51   :  { %2530 = vmatprep.subr.bf16.mxu0 %v5117_v4  ;;  %2869 = vmatprep.subr.bf16.mxu1 %v5119_v5  ;;  %v5123_v8 = vld [vmem:[#allocation6 + $0x44] ss:$16 sps:$4 sm:$0xff]   ;;  %v5125_v9 = vld [vmem:[#allocation6 + $0x4c] ss:$16 sps:$4 sm:$0xff]   ;;  %v5127_v10 = vld [vmem:[#allocation6 + $0x40] ss:$16 sps:$4 sm:$0xff]  }
  0x52   :  { %v5128_v11 = vld [vmem:[#allocation6 + $0x48] ss:$16 sps:$4 sm:$0xff]   ;;  %v5129_v12 = vld [vmem:[#allocation6 + $0x64] ss:$16 sps:$4 sm:$0xff]   ;;  %v5131_v13 = vld [vmem:[#allocation6 + $0x6c] ss:$16 sps:$4 sm:$0xff]  }
  0x53   :  { %v5133_v14 = vld [vmem:[#allocation6 + $0x60] ss:$16 sps:$4 sm:$0xff]   ;;  %v5134_v15 = vld [vmem:[#allocation6 + $0x68] ss:$16 sps:$4 sm:$0xff]   ;;  %v5135_v16 = vld [vmem:[#allocation6 + $0x84] ss:$16 sps:$4 sm:$0xff]  }
  0x54   :  { %2531 = vmatpush1.bf16.msra.mxu0 %v5121_v6  ;;  %2870 = vmatpush1.bf16.msra.mxu1 %v5122_v7  ;;  %v5137_v17 = vld [vmem:[#allocation6 + $0x8c] ss:$16 sps:$4 sm:$0xff]   ;;  %v5139_v18 = vld [vmem:[#allocation6 + $0x80] ss:$16 sps:$4 sm:$0xff]   ;;  %v5140_v19 = vld [vmem:[#allocation6 + $0x88] ss:$16 sps:$4 sm:$0xff]  }
  0x55   :  { %2532 = vmatprep.subr.bf16.mxu0 %v5123_v8  ;;  %2871 = vmatprep.subr.bf16.mxu1 %v5125_v9  ;;  %v5141_v20 = vld [vmem:[#allocation6 + $0xa4] ss:$16 sps:$4 sm:$0xff]   ;;  %v5143_v21 = vld [vmem:[#allocation6 + $0xac] ss:$16 sps:$4 sm:$0xff]   ;;  %v5145_v22 = vld [vmem:[#allocation6 + $0xa0] ss:$16 sps:$4 sm:$0xff]  }
  0x56   :  { %v5146_v23 = vld [vmem:[#allocation6 + $0xa8] ss:$16 sps:$4 sm:$0xff]   ;;  %v5147_v24 = vld [vmem:[#allocation6 + $0xc4] ss:$16 sps:$4 sm:$0xff]   ;;  %v5149_v25 = vld [vmem:[#allocation6 + $0xcc] ss:$16 sps:$4 sm:$0xff]  }
  0x57   :  { %v5151_v26 = vld [vmem:[#allocation6 + $0xc0] ss:$16 sps:$4 sm:$0xff]   ;;  %v5152_v27 = vld [vmem:[#allocation6 + $0xc8] ss:$16 sps:$4 sm:$0xff]   ;;  %v5153_v28 = vld [vmem:[#allocation6 + $0xe4] ss:$16 sps:$4 sm:$0xff]  }
  0x58   :  { %2533 = vmatpush1.bf16.msra.mxu0 %v5127_v10  ;;  %2872 = vmatpush1.bf16.msra.mxu1 %v5128_v11  ;;  %v5155_v29 = vld [vmem:[#allocation6 + $0xec] ss:$16 sps:$4 sm:$0xff]   ;;  %v5157_v30 = vld [vmem:[#allocation6 + $0xe0] ss:$16 sps:$4 sm:$0xff]   ;;  %v5158_v31 = vld [vmem:[#allocation6 + $0xe8] ss:$16 sps:$4 sm:$0xff]  }
  0x59   :  { %2534 = vmatprep.subr.bf16.mxu0 %v5129_v12  ;;  %2873 = vmatprep.subr.bf16.mxu1 %v5131_v13  ;;  %v5159_v32 = vld [vmem:[#allocation6 + $0x104] ss:$16 sps:$4 sm:$0xff]   ;;  %v5161_v33 = vld [vmem:[#allocation6 + $0x10c] ss:$16 sps:$4 sm:$0xff]   ;;  %v5163_v34 = vld [vmem:[#allocation6 + $0x100] ss:$16 sps:$4 sm:$0xff]  }
  0x5a   :  { %v5164_v35 = vld [vmem:[#allocation6 + $0x108] ss:$16 sps:$4 sm:$0xff]   ;;  %v5165_v36 = vld [vmem:[#allocation6 + $0x124] ss:$16 sps:$4 sm:$0xff]   ;;  %v5167_v37 = vld [vmem:[#allocation6 + $0x12c] ss:$16 sps:$4 sm:$0xff]  }
  0x5b   :  { %v5169_v38 = vld [vmem:[#allocation6 + $0x120] ss:$16 sps:$4 sm:$0xff]   ;;  %v5769_v39 = vmov 1983009808   ;;  %v5170_v42 = vld [vmem:[#allocation6 + $0x128] ss:$16 sps:$4 sm:$0xff]  }
  0x5c   :  { %2535 = vmatpush1.bf16.msra.mxu0 %v5133_v14  ;;  %2874 = vmatpush1.bf16.msra.mxu1 %v5134_v15  ;;  %v351_v40 = vunpack.c.l.s4 %v5769_v39  ;;  %v5171_v43 = vld [vmem:[#allocation6 + $0x144] ss:$16 sps:$4 sm:$0xff]   ;;  %v5173_v44 = vld [vmem:[#allocation6 + $0x14c] ss:$16 sps:$4 sm:$0xff]   ;;  %v5175_v45 = vld [vmem:[#allocation6 + $0x140] ss:$16 sps:$4 sm:$0xff]  }
  0x5d   :  { %2536 = vmatprep.subr.bf16.mxu0 %v5135_v16  ;;  %2875 = vmatprep.subr.bf16.mxu1 %v5137_v17  ;;  %v5176_v46 = vld [vmem:[#allocation6 + $0x148] ss:$16 sps:$4 sm:$0xff]   ;;  %v5870_v48 = vshrl.u32 %v353_v41, 7  ;;  %v5177_v49 = vld [vmem:[#allocation6 + $0x164] ss:$16 sps:$4 sm:$0xff]   ;;  %vm4352_vm0 = vcmask 130112  }
  0x5e   :  { %v352_v47 = vunpack.c.0.s8 %v351_v40  ;;  %v5179_v50 = vld [vmem:[#allocation6 + $0x16c] ss:$16 sps:$4 sm:$0xff]   ;;  %v5181_v51 = vld [vmem:[#allocation6 + $0x160] ss:$16 sps:$4 sm:$0xff]   ;;  %v5182_v52 = vld [vmem:[#allocation6 + $0x168] ss:$16 sps:$4 sm:$0xff]  }
  0x5f   :  { %v5183_v53 = vld [vmem:[#allocation6 + $0x184] ss:$16 sps:$4 sm:$0xff]   ;;  %v5185_v55 = vld [vmem:[#allocation6 + $0x18c] ss:$16 sps:$4 sm:$0xff]   ;;  %v5187_v59 = vld [vmem:[#allocation6 + $0x180] ss:$16 sps:$4 sm:$0xff]  }
  0x60   :  { %2537 = vmatpush1.bf16.msra.mxu0 %v5139_v18  ;;  %2876 = vmatpush1.bf16.msra.mxu1 %v5140_v19  ;;  %v5873_v54 = vsub.s32 %v352_v47, %v5870_v48  ;;  %v5207_v56 = vld [vmem:[#allocation3] ss:$12 sps:$4 sm:$0xff]   ;;  %v5210_v57 = vld [vmem:[#allocation3 + $0x18] ss:$12 sps:$4 sm:$0xff]   ;;  %v5213_v58 = vld [vmem:[#allocation3 + $0x30] ss:$12 sps:$4 sm:$0xff]  }
  0x61   :  { %2538 = vmatprep.subr.bf16.mxu0 %v5141_v20  ;;  %2877 = vmatprep.subr.bf16.mxu1 %v5143_v21  ;;  %v5188_v60 = vld [vmem:[#allocation6 + $0x188] ss:$16 sps:$4 sm:$0xff]   ;;  %v5189_v63 = vld [vmem:[#allocation6 + $0x1a4] ss:$16 sps:$4 sm:$0xff]   ;;  %v5191_v2 = vld [vmem:[#allocation6 + $0x1ac] ss:$16 sps:$4 sm:$0xff]  }
  0x62   :  { %v356_v61 = vrot.slane %v5207_v56, %v5873_v54  ;;  %v5216_v62 = vld [vmem:[#allocation3 + $0x48] ss:$12 sps:$4 sm:$0xff]   ;;  %v370_v0 = vrot.slane %v5210_v57, %v5873_v54  ;;  %v410_v1 = vrot.slane %v5213_v58, %v5873_v54  ;;  %v5193_v5 = vld [vmem:[#allocation6 + $0x1a0] ss:$16 sps:$4 sm:$0xff]   ;;  %v5197_v9 = vld [vmem:[#allocation6 + $0x1cc] ss:$16 sps:$4 sm:$0xff]  }
  0x63   :  { %v424_v3 = vrot.slane %v5216_v62, %v5873_v54  ;;  %v5194_v6 = vld [vmem:[#allocation6 + $0x1a8] ss:$16 sps:$4 sm:$0xff]   ;;  %v5195_v8 = vld [vmem:[#allocation6 + $0x1c4] ss:$16 sps:$4 sm:$0xff]   ;;  %v5199_v11 = vld [vmem:[#allocation6 + $0x1c0] ss:$16 sps:$4 sm:$0xff]  }
  0x64   :  { %2539 = vmatpush1.bf16.msra.mxu0 %v5145_v22  ;;  %2878 = vmatpush1.bf16.msra.mxu1 %v5146_v23  ;;  %v379_v4 = vcombine.high %v356_v61, %v370_v0  ;;  %v5200_v12 = vld [vmem:[#allocation6 + $0x1c8] ss:$16 sps:$4 sm:$0xff]   ;;  %v5201_v13 = vld [vmem:[#allocation6 + $0x1e4] ss:$16 sps:$4 sm:$0xff]   ;;  %v5203_v14 = vld [vmem:[#allocation6 + $0x1ec] ss:$16 sps:$4 sm:$0xff]  }
  0x65   :  { %2540 = vmatprep.subr.bf16.mxu0 %v5147_v24  ;;  %2879 = vmatprep.subr.bf16.mxu1 %v5149_v25  ;;  %v433_v7 = vcombine.high %v410_v1, %v424_v3  ;;  %v5231_v15 = vld [vmem:[#allocation3 + $0x60] ss:$12 sps:$4 sm:$0xff]   ;;  %v5233_v16 = vld [vmem:[#allocation3 + $0x78] ss:$12 sps:$4 sm:$0xff]   ;;  %v5235_v17 = vld [vmem:[#allocation3 + $0x90] ss:$12 sps:$4 sm:$0xff]   ;;  %v378_v24 = vcombine.low %v356_v61, %v370_v0  ;;  %v432_v25 = vcombine.low %v410_v1, %v424_v3 }
  0x66   :  { %v5237_v18 = vld [vmem:[#allocation3 + $0xa8] ss:$12 sps:$4 sm:$0xff]   ;;  %v464_v19 = vrot.slane %v5231_v15, %v5873_v54  ;;  %v478_v20 = vrot.slane %v5233_v16, %v5873_v54  ;;  %v518_v21 = vrot.slane %v5235_v17, %v5873_v54  ;;  %v5205_v22 = vld [vmem:[#allocation6 + $0x1e0] ss:$16 sps:$4 sm:$0xff]   ;;  %v5273_v3 = vld [vmem:[#allocation3 + $0x138] ss:$12 sps:$4 sm:$0xff]  }
  0x67   :  { %v1307_v10 = vpack.c.bf16 %v433_v7, %v379_v4  ;;  %v5206_v23 = vld [vmem:[#allocation6 + $0x1e8] ss:$16 sps:$4 sm:$0xff]   ;;  %v5255_v40 = vld [vmem:[#allocation3 + $0xf0] ss:$12 sps:$4 sm:$0xff]   ;;  %v5271_v0 = vld [vmem:[#allocation3 + $0x120] ss:$12 sps:$4 sm:$0xff]  }
  0x68   :  { %2541 = vmatpush1.bf16.msra.mxu0 %v5151_v26  ;;  %2880 = vmatpush1.bf16.msra.mxu1 %v5152_v27  ;;  %v532_v26 = vrot.slane %v5237_v18, %v5873_v54  ;;  %v5221_v27 = vld [vmem:[#allocation6 + $0x204] ss:$16 sps:$4 sm:$0xff]   ;;  %v486_v39 = vcombine.low %v464_v19, %v478_v20  ;;  %v5245_v61 = vld [vmem:[#allocation6 + $0x260] ss:$16 sps:$4 sm:$0xff]   ;;  %v5248_v62 = vld [vmem:[#allocation6 + $0x268] ss:$16 sps:$4 sm:$0xff]   ;;  %v680_v7 = vrot.slane %v5271_v0, %v5873_v54 }
  0x69   :  { %2542 = vmatprep.subr.bf16.mxu0 %v5153_v28  ;;  %2881 = vmatprep.subr.bf16.mxu1 %v5155_v29  ;;  %v5224_v28 = vld [vmem:[#allocation6 + $0x20c] ss:$16 sps:$4 sm:$0xff]   ;;  %v5219_v29 = vld [vmem:[#allocation6 + $0x200] ss:$16 sps:$4 sm:$0xff]   ;;  %v5267_v17 = vld [vmem:[#allocation6 + $0x2a4] ss:$16 sps:$4 sm:$0xff]  }
  0x6a   :  { %2560 = vmatprep.mubr.bf16.mxu0 %v1307_v10  ;;  %2899 = vmatprep.mubr.bf16.mxu1 %v1307_v10  ;;  %v5275_v4 = vld [vmem:[#allocation3 + $0x150] ss:$12 sps:$4 sm:$0xff]   ;;  %vm4359_vm1 = vcmask 195712   ;;  %vm4366_vm2 = vcmask 261312   ;;  %vm4373_vm3 = vcmask 326912   ;;  %vm4380_vm4 = vcmask 392512  }
  0x6b   :  { %v734_v10 = vrot.slane %v5275_v4, %v5873_v54  ;;  %v5270_v18 = vld [vmem:[#allocation6 + $0x2ac] ss:$16 sps:$4 sm:$0xff]   ;;  %vm4387_vm5 = vcmask 458112   ;;  %vm4394_vm6 = vcmask 523712   ;;  %vm4401_vm7 = vcmask 589312  }
  0x6c   :  { %2543 = vmatpush1.bf16.msra.mxu0 %v5157_v30  ;;  %2882 = vmatpush1.bf16.msra.mxu1 %v5158_v31  ;;  %v5222_v30 = vld [vmem:[#allocation6 + $0x208] ss:$16 sps:$4 sm:$0xff]   ;;  %v487_v31 = vcombine.high %v464_v19, %v478_v20  ;;  %v5265_v19 = vld [vmem:[#allocation6 + $0x2a0] ss:$16 sps:$4 sm:$0xff]   ;;  %vm4408_vm8 = vcmask 654912   ;;  %vm4415_vm9 = vcmask 720512  }
  0x6d   :  { %2544 = vmatprep.subr.bf16.mxu0 %v5159_v32  ;;  %2883 = vmatprep.subr.bf16.mxu1 %v5161_v33  ;;  %v541_v32 = vcombine.high %v518_v21, %v532_v26  ;;  %v1306_v33 = vpack.c.bf16 %v432_v25, %v378_v24  ;;  %v5268_v20 = vld [vmem:[#allocation6 + $0x2a8] ss:$16 sps:$4 sm:$0xff]   ;;  %v5281_v24 = vld [vmem:[#allocation6 + $0x2c4] ss:$16 sps:$4 sm:$0xff]   ;;  %v5284_v25 = vld [vmem:[#allocation6 + $0x2cc] ss:$16 sps:$4 sm:$0xff]  }
  0x6e   :  { %vm4422_vm10 = vcmask 786112   ;;  %vm4429_vm11 = vcmask 851712   ;;  %vm4436_vm12 = vcmask 917312   ;;  %vm4443_vm13 = vcmask 982912  }
  0x6f   :  { %vm4450_vm14 = vcmask 1048512  }
  0x70   :  { %2545 = vmatpush1.bf16.msra.mxu0 %v5163_v34  ;;  %2884 = vmatpush1.bf16.msra.mxu1 %v5164_v35  ;;  %v5227_v34 = vld [vmem:[#allocation6 + $0x224] ss:$16 sps:$4 sm:$0xff]   ;;  %v5230_v35 = vld [vmem:[#allocation6 + $0x22c] ss:$16 sps:$4 sm:$0xff]  }
  0x71   :  { %2546 = vmatprep.subr.bf16.mxu0 %v5165_v36  ;;  %2885 = vmatprep.subr.bf16.mxu1 %v5167_v37  ;;  %v5251_v36 = vld [vmem:[#allocation3 + $0xc0] ss:$12 sps:$4 sm:$0xff]   ;;  %v5253_v37 = vld [vmem:[#allocation3 + $0xd8] ss:$12 sps:$4 sm:$0xff]  }
  0x72   :  { %v586_v47 = vrot.slane %v5253_v37, %v5873_v54  ;;  %v5287_v37 = vld [vmem:[#allocation6 + $0x2e4] ss:$16 sps:$4 sm:$0xff]  }
  0x74   :  { %2547 = vmatpush1.bf16.msra.mxu0 %v5169_v38  ;;  %2886 = vmatpush1.bf16.msra.mxu1 %v5170_v42  ;;  %v1313_v38 = vpack.c.bf16 %v541_v32, %v487_v31  ;;  %v5257_v42 = vld [vmem:[#allocation3 + $0x108] ss:$12 sps:$4 sm:$0xff]  }
  0x75   :  { %2548 = vmatprep.subr.bf16.mxu0 %v5171_v43  ;;  %2887 = vmatprep.subr.bf16.mxu1 %v5173_v44  ;;  %v5225_v43 = vld [vmem:[#allocation6 + $0x220] ss:$16 sps:$4 sm:$0xff]   ;;  %v5228_v44 = vld [vmem:[#allocation6 + $0x228] ss:$16 sps:$4 sm:$0xff]  }
  0x78   :  { %2549 = vmatpush1.bf16.msra.mxu0 %v5175_v45  ;;  %2888 = vmatpush1.bf16.msra.mxu1 %v5176_v46  ;;  %v540_v45 = vcombine.low %v518_v21, %v532_v26  ;;  %v572_v46 = vrot.slane %v5251_v36, %v5873_v54  ;;  %v5291_v26 = vld [vmem:[#allocation3 + $0x180] ss:$12 sps:$4 sm:$0xff]  }
  0x79   :  { %2550 = vmatprep.subr.bf16.mxu0 %v5177_v49  ;;  %2889 = vmatprep.subr.bf16.mxu1 %v5179_v50  ;;  %v5241_v49 = vld [vmem:[#allocation6 + $0x244] ss:$16 sps:$4 sm:$0xff]   ;;  %v626_v50 = vrot.slane %v5255_v40, %v5873_v54 }
  0x7a   :  { %v595_v56 = vcombine.high %v572_v46, %v586_v47  ;;  %v1312_v58 = vpack.c.bf16 %v540_v45, %v486_v39  ;;  %v594_v1 = vcombine.low %v572_v46, %v586_v47  ;;  %v5290_v39 = vld [vmem:[#allocation6 + $0x2ec] ss:$16 sps:$4 sm:$0xff]   ;;  %v5301_v47 = vld [vmem:[#allocation6 + $0x304] ss:$16 sps:$4 sm:$0xff]  }
  0x7c   :  { %2551 = vmatpush1.bf16.msra.mxu0 %v5181_v51  ;;  %2890 = vmatpush1.bf16.msra.mxu1 %v5182_v52  ;;  %v640_v51 = vrot.slane %v5257_v42, %v5873_v54  ;;  %v5244_v52 = vld [vmem:[#allocation6 + $0x24c] ss:$16 sps:$4 sm:$0xff]   ;;  %v5285_v42 = vld [vmem:[#allocation6 + $0x2e0] ss:$16 sps:$4 sm:$0xff]  }
  0x7d   :  { %2552 = vmatprep.subr.bf16.mxu0 %v5183_v53  ;;  %2891 = vmatprep.subr.bf16.mxu1 %v5185_v55  ;;  %v5239_v53 = vld [vmem:[#allocation6 + $0x240] ss:$16 sps:$4 sm:$0xff]   ;;  %v5242_v55 = vld [vmem:[#allocation6 + $0x248] ss:$16 sps:$4 sm:$0xff]  }
  0x7e   :  { %v649_v57 = vcombine.high %v626_v50, %v640_v51 }
  0x80   :  { %2553 = vmatpush1.bf16.msra.mxu0 %v5187_v59  ;;  %2892 = vmatpush1.bf16.msra.mxu1 %v5188_v60  ;;  %v5247_v59 = vld [vmem:[#allocation6 + $0x264] ss:$16 sps:$4 sm:$0xff]   ;;  %v5250_v60 = vld [vmem:[#allocation6 + $0x26c] ss:$16 sps:$4 sm:$0xff]  }
  0x81   :  { %2554 = vmatprep.subr.bf16.mxu0 %v5189_v63  ;;  %2893 = vmatprep.subr.bf16.mxu1 %v5191_v2  ;;  %v1319_v63 = vpack.c.bf16 %v649_v57, %v595_v56  ;;  %v648_v2 = vcombine.low %v626_v50, %v640_v51  ;;  %v5311_v50 = vld [vmem:[#allocation3 + $0x1e0] ss:$12 sps:$4 sm:$0xff]   ;;  %v5313_v51 = vld [vmem:[#allocation3 + $0x1f8] ss:$12 sps:$4 sm:$0xff]  }
  0x82   :  { %v5299_v56 = vld [vmem:[#allocation6 + $0x300] ss:$16 sps:$4 sm:$0xff]   ;;  %v5302_v57 = vld [vmem:[#allocation6 + $0x308] ss:$16 sps:$4 sm:$0xff]  }
  0x84   :  { %2555 = vmatpush1.bf16.msra.mxu0 %v5193_v5  ;;  %2894 = vmatpush1.bf16.msra.mxu1 %v5194_v6  ;;  %v5277_v5 = vld [vmem:[#allocation3 + $0x168] ss:$12 sps:$4 sm:$0xff]  }
  0x85   :  { %2556 = vmatprep.subr.bf16.mxu0 %v5195_v8  ;;  %2895 = vmatprep.subr.bf16.mxu1 %v5197_v9  ;;  %v5261_v6 = vld [vmem:[#allocation6 + $0x284] ss:$16 sps:$4 sm:$0xff]   ;;  %v5264_v8 = vld [vmem:[#allocation6 + $0x28c] ss:$16 sps:$4 sm:$0xff]   ;;  %v694_v9 = vrot.slane %v5273_v3, %v5873_v54 }
  0x87   :  { %v703_v15 = vcombine.high %v680_v7, %v694_v9 }
  0x88   :  { %2557 = vmatpush1.bf16.msra.mxu0 %v5199_v11  ;;  %2896 = vmatpush1.bf16.msra.mxu1 %v5200_v12  ;;  %v748_v11 = vrot.slane %v5277_v5, %v5873_v54  ;;  %v1318_v12 = vpack.c.bf16 %v648_v2, %v594_v1  ;;  %v5305_v1 = vld [vmem:[#allocation6 + $0x320] ss:$16 sps:$4 sm:$0xff]   ;;  %v5308_v2 = vld [vmem:[#allocation6 + $0x328] ss:$16 sps:$4 sm:$0xff]  }
  0x89   :  { %2558 = vmatprep.subr.bf16.mxu0 %v5201_v13  ;;  %2897 = vmatprep.subr.bf16.mxu1 %v5203_v14  ;;  %v5259_v13 = vld [vmem:[#allocation6 + $0x280] ss:$16 sps:$4 sm:$0xff]   ;;  %v5262_v14 = vld [vmem:[#allocation6 + $0x288] ss:$16 sps:$4 sm:$0xff]  }
  0x8a   :  { %v757_v16 = vcombine.high %v734_v10, %v748_v11 }
  0x8c   :  { %2559 = vmatpush1.bf16.msra.mxu0 %v5205_v22  ;;  %2898 = vmatpush1.bf16.msra.mxu1 %v5206_v23  ;;  %v1325_v21 = vpack.c.bf16 %v757_v16, %v703_v15  ;;  %v702_v22 = vcombine.low %v680_v7, %v694_v9  ;;  %v756_v23 = vcombine.low %v734_v10, %v748_v11  ;;  %v5324_v7 = vld [vmem:[#allocation6 + $0x34c] ss:$16 sps:$4 sm:$0xff]   ;;  %v5319_v9 = vld [vmem:[#allocation6 + $0x340] ss:$16 sps:$4 sm:$0xff]   ;;  %v5322_v10 = vld [vmem:[#allocation6 + $0x348] ss:$16 sps:$4 sm:$0xff]  }
  0x8d   :  { %2641 = vmatprep.subr.bf16.mxu0 %v5221_v27  ;;  %2980 = vmatprep.subr.bf16.mxu1 %v5224_v28  ;;  %v5293_v27 = vld [vmem:[#allocation3 + $0x198] ss:$12 sps:$4 sm:$0xff]   ;;  %v5295_v28 = vld [vmem:[#allocation3 + $0x1b0] ss:$12 sps:$4 sm:$0xff]   ;;  %v5331_v11 = vld [vmem:[#allocation3 + $0x240] ss:$12 sps:$4 sm:$0xff]  }
  0x8e   :  { %v802_v31 = vrot.slane %v5293_v27, %v5873_v54  ;;  %v842_v32 = vrot.slane %v5295_v28, %v5873_v54  ;;  %v5337_v15 = vld [vmem:[#allocation3 + $0x288] ss:$12 sps:$4 sm:$0xff]  }
  0x8f   :  { %2561 = vmatmul.mubr.bf16.vlgmr.msra.gmra.mrb[0].mxu0 %v1306_v33  ;;  %2900 = vmatmul.mubr.bf16.vlgmr.msra.gmra.mrb[0].mxu1 %v1306_v33  ;;  %v1324_v33 = vpack.c.bf16 %v756_v23, %v702_v22  ;;  %v5327_v16 = vld [vmem:[#allocation6 + $0x364] ss:$16 sps:$4 sm:$0xff]   ;;  %v5212_v23 = vld [vmem:[#allocation3 + $0x1c] ss:$12 sps:$4 sm:$0xff]  }
  0x90   :  { %2642 = vmatpush1.bf16.msra.mxu0 %v5219_v29  ;;  %2981 = vmatpush1.bf16.msra.mxu1 %v5222_v30  ;;  %v5297_v29 = vld [vmem:[#allocation3 + $0x1c8] ss:$12 sps:$4 sm:$0xff]   ;;  %v788_v30 = vrot.slane %v5291_v26, %v5873_v54  ;;  %v5209_v22 = vld [vmem:[#allocation3 + $0x4] ss:$12 sps:$4 sm:$0xff]  }
  0x91   :  { %2643 = vmatprep.subr.bf16.mxu0 %v5227_v34  ;;  %2982 = vmatprep.subr.bf16.mxu1 %v5230_v35  ;;  %v5279_v34 = vld [vmem:[#allocation6 + $0x2c0] ss:$16 sps:$4 sm:$0xff]   ;;  %v5282_v35 = vld [vmem:[#allocation6 + $0x2c8] ss:$16 sps:$4 sm:$0xff]   ;;  %v856_v36 = vrot.slane %v5297_v29, %v5873_v54 }
  0x92   :  { %2570 = vmatprep.mubr.bf16.mxu0 %v1313_v38  ;;  %2909 = vmatprep.mubr.bf16.mxu1 %v1313_v38  ;;  %v811_v38 = vcombine.high %v788_v30, %v802_v31  ;;  %v810_v45 = vcombine.low %v788_v30, %v802_v31  ;;  %v5328_v26 = vld [vmem:[#allocation6 + $0x368] ss:$16 sps:$4 sm:$0xff]  }
  0x93   :  { %v865_v40 = vcombine.high %v842_v32, %v856_v36  ;;  %v864_v46 = vcombine.low %v842_v32, %v856_v36  ;;  %v5218_v30 = vld [vmem:[#allocation3 + $0x4c] ss:$12 sps:$4 sm:$0xff]   ;;  %v5341_v32 = vld [vmem:[#allocation6 + $0x384] ss:$16 sps:$4 sm:$0xff]  }
  0x94   :  { %2644 = vmatpush1.bf16.msra.mxu0 %v5225_v43  ;;  %2983 = vmatpush1.bf16.msra.mxu1 %v5228_v44  ;;  %v5288_v43 = vld [vmem:[#allocation6 + $0x2e8] ss:$16 sps:$4 sm:$0xff]  }
  0x95   :  { %2645 = vmatprep.subr.bf16.mxu0 %v5241_v49  ;;  %2984 = vmatprep.subr.bf16.mxu1 %v5244_v52  ;;  %v1331_v44 = vpack.c.bf16 %v865_v40, %v811_v38  ;;  %v5304_v49 = vld [vmem:[#allocation6 + $0x30c] ss:$16 sps:$4 sm:$0xff]   ;;  %v5342_v36 = vld [vmem:[#allocation6 + $0x388] ss:$16 sps:$4 sm:$0xff]   ;;  %v5347_v38 = vld [vmem:[#allocation6 + $0x3a4] ss:$16 sps:$4 sm:$0xff]  }
  0x96   :  { %v5315_v52 = vld [vmem:[#allocation3 + $0x210] ss:$12 sps:$4 sm:$0xff]   ;;  %v5351_v40 = vld [vmem:[#allocation3 + $0x2a0] ss:$12 sps:$4 sm:$0xff]  }
  0x97   :  { %2571 = vmatmul.mubr.bf16.gmra.mrb[4].mxu0 %v1312_v58  ;;  %2910 = vmatmul.mubr.bf16.gmra.mrb[4].mxu1 %v1312_v58  ;;  %v896_v58 = vrot.slane %v5311_v50, %v5873_v54 }
  0x98   :  { %2646 = vmatpush1.bf16.msra.mxu0 %v5239_v53  ;;  %2985 = vmatpush1.bf16.msra.mxu1 %v5242_v55  ;;  %v5317_v53 = vld [vmem:[#allocation3 + $0x228] ss:$12 sps:$4 sm:$0xff]   ;;  %v1330_v55 = vpack.c.bf16 %v864_v46, %v810_v45  ;;  %v363_v45 = vrot.slane %v5209_v22, %v5873_v54  ;;  %v377_v46 = vrot.slane %v5212_v23, %v5873_v54  ;;  %v5371_v22 = vld [vmem:[#allocation6 + $0x400] ss:$16 sps:$4 sm:$0xff]  }
  0x99   :  { %2647 = vmatprep.subr.bf16.mxu0 %v5247_v59  ;;  %2986 = vmatprep.subr.bf16.mxu1 %v5250_v60  ;;  %v910_v59 = vrot.slane %v5313_v51, %v5873_v54  ;;  %v5307_v60 = vld [vmem:[#allocation6 + $0x324] ss:$16 sps:$4 sm:$0xff]   ;;  %v5374_v23 = vld [vmem:[#allocation6 + $0x408] ss:$16 sps:$4 sm:$0xff]  }
  0x9a   :  { %2580 = vmatprep.mubr.bf16.mxu0 %v1319_v63  ;;  %2919 = vmatprep.mubr.bf16.mxu1 %v1319_v63  ;;  %v5310_v63 = vld [vmem:[#allocation6 + $0x32c] ss:$16 sps:$4 sm:$0xff]  }
  0x9b   :  { %v919_v0 = vcombine.high %v896_v58, %v910_v59  ;;  %v918_v4 = vcombine.low %v896_v58, %v910_v59 }
  0x9c   :  { %2648 = vmatpush1.bf16.msra.mxu0 %v5245_v61  ;;  %2987 = vmatpush1.bf16.msra.mxu1 %v5248_v62  ;;  %v950_v61 = vrot.slane %v5315_v52, %v5873_v54  ;;  %v964_v62 = vrot.slane %v5317_v53, %v5873_v54  ;;  %v431_v52 = vrot.slane %v5218_v30, %v5873_v54  ;;  %v5345_v53 = vld [vmem:[#allocation6 + $0x3a0] ss:$16 sps:$4 sm:$0xff]   ;;  %v5380_v30 = vld [vmem:[#allocation6 + $0x428] ss:$16 sps:$4 sm:$0xff]  }
  0x9d   :  { %2649 = vmatprep.subr.bf16.mxu0 %v5261_v6  ;;  %2988 = vmatprep.subr.bf16.mxu1 %v5264_v8  ;;  %v5321_v6 = vld [vmem:[#allocation6 + $0x344] ss:$16 sps:$4 sm:$0xff]  }
  0x9e   :  { %v973_v3 = vcombine.high %v950_v61, %v964_v62  ;;  %v972_v5 = vcombine.low %v950_v61, %v964_v62  ;;  %v5361_v61 = vld [vmem:[#allocation6 + $0x3c4] ss:$16 sps:$4 sm:$0xff]   ;;  %v5364_v62 = vld [vmem:[#allocation6 + $0x3cc] ss:$16 sps:$4 sm:$0xff]  }
  0x9f   :  { %2581 = vmatmul.mubr.bf16.gmra.mrb[8].mxu0 %v1318_v12  ;;  %2920 = vmatmul.mubr.bf16.gmra.mrb[8].mxu1 %v1318_v12 }
  0xa0   :  { %2650 = vmatpush1.bf16.msra.mxu0 %v5259_v13  ;;  %2989 = vmatpush1.bf16.msra.mxu1 %v5262_v14  ;;  %v1337_v8 = vpack.c.bf16 %v973_v3, %v919_v0  ;;  %v1336_v12 = vpack.c.bf16 %v972_v5, %v918_v4  ;;  %v5333_v13 = vld [vmem:[#allocation3 + $0x258] ss:$12 sps:$4 sm:$0xff]   ;;  %v5335_v14 = vld [vmem:[#allocation3 + $0x270] ss:$12 sps:$4 sm:$0xff]  }
  0xa1   :  { %2651 = vmatprep.subr.bf16.mxu0 %v5267_v17  ;;  %2990 = vmatprep.subr.bf16.mxu1 %v5270_v18  ;;  %v1004_v17 = vrot.slane %v5331_v11, %v5873_v54  ;;  %v5330_v18 = vld [vmem:[#allocation6 + $0x36c] ss:$16 sps:$4 sm:$0xff]   ;;  %v5359_v3 = vld [vmem:[#allocation6 + $0x3c0] ss:$16 sps:$4 sm:$0xff]   ;;  %v5362_v4 = vld [vmem:[#allocation6 + $0x3c8] ss:$16 sps:$4 sm:$0xff]  }
  0xa2   :  { %2590 = vmatprep.mubr.bf16.mxu0 %v1325_v21  ;;  %2929 = vmatprep.mubr.bf16.mxu1 %v1325_v21  ;;  %v1072_v21 = vrot.slane %v5337_v15, %v5873_v54  ;;  %v5367_v5 = vld [vmem:[#allocation6 + $0x3e4] ss:$16 sps:$4 sm:$0xff]   ;;  %v5384_v15 = vld [vmem:[#allocation3 + $0x7c] ss:$12 sps:$4 sm:$0xff]  }
  0xa4   :  { %2652 = vmatpush1.bf16.msra.mxu0 %v5265_v19  ;;  %2991 = vmatpush1.bf16.msra.mxu1 %v5268_v20  ;;  %v1018_v19 = vrot.slane %v5333_v13, %v5873_v54  ;;  %v1058_v20 = vrot.slane %v5335_v14, %v5873_v54  ;;  %v5376_v13 = vld [vmem:[#allocation6 + $0x40c] ss:$16 sps:$4 sm:$0xff]   ;;  %v5383_v14 = vld [vmem:[#allocation3 + $0x64] ss:$12 sps:$4 sm:$0xff]  }
  0xa5   :  { %2653 = vmatprep.subr.bf16.mxu0 %v5281_v24  ;;  %2992 = vmatprep.subr.bf16.mxu1 %v5284_v25  ;;  %v5215_v24 = vld [vmem:[#allocation3 + $0x34] ss:$12 sps:$4 sm:$0xff]  }
  0xa6   :  { %v5325_v25 = vld [vmem:[#allocation6 + $0x360] ss:$16 sps:$4 sm:$0xff]   ;;  %v1027_v27 = vcombine.high %v1004_v17, %v1018_v19  ;;  %v1081_v28 = vcombine.high %v1058_v20, %v1072_v21  ;;  %v1026_v29 = vcombine.low %v1004_v17, %v1018_v19  ;;  %v1080_v31 = vcombine.low %v1058_v20, %v1072_v21  ;;  %v5386_v17 = vld [vmem:[#allocation3 + $0xac] ss:$12 sps:$4 sm:$0xff]  }
  0xa7   :  { %2591 = vmatmul.mubr.bf16.gmra.mrb[12].mxu0 %v1324_v33  ;;  %2930 = vmatmul.mubr.bf16.gmra.mrb[12].mxu1 %v1324_v33  ;;  %v485_v19 = vrot.slane %v5384_v15, %v5873_v54  ;;  %v5434_v15 = vld [vmem:[#allocation3 + $0x1cc] ss:$12 sps:$4 sm:$0xff]  }
  0xa8   :  { %2654 = vmatpush1.bf16.msra.mxu0 %v5279_v34  ;;  %2993 = vmatpush1.bf16.msra.mxu1 %v5282_v35  ;;  %v1343_v33 = vpack.c.bf16 %v1081_v28, %v1027_v27  ;;  %v5344_v34 = vld [vmem:[#allocation6 + $0x38c] ss:$16 sps:$4 sm:$0xff]   ;;  %v5339_v35 = vld [vmem:[#allocation6 + $0x380] ss:$16 sps:$4 sm:$0xff]  }
  0xa9   :  { %2655 = vmatprep.subr.bf16.mxu0 %v5287_v37  ;;  %2994 = vmatprep.subr.bf16.mxu1 %v5290_v39  ;;  %v1342_v37 = vpack.c.bf16 %v1080_v31, %v1026_v29  ;;  %v5350_v39 = vld [vmem:[#allocation6 + $0x3ac] ss:$16 sps:$4 sm:$0xff]   ;;  %v5377_v29 = vld [vmem:[#allocation6 + $0x420] ss:$16 sps:$4 sm:$0xff]  }
  0xaa   :  { %2600 = vmatprep.mubr.bf16.mxu0 %v1331_v44  ;;  %2939 = vmatprep.mubr.bf16.mxu1 %v1331_v44  ;;  %v5357_v44 = vld [vmem:[#allocation3 + $0x2e8] ss:$12 sps:$4 sm:$0xff]   ;;  %v5382_v27 = vld [vmem:[#allocation6 + $0x42c] ss:$16 sps:$4 sm:$0xff]   ;;  %v5399_v31 = vld [vmem:[#allocation3 + $0xc4] ss:$12 sps:$4 sm:$0xff]  }
  0xac   :  { %2656 = vmatpush1.bf16.msra.mxu0 %v5285_v42  ;;  %2995 = vmatpush1.bf16.msra.mxu1 %v5288_v43  ;;  %v5353_v42 = vld [vmem:[#allocation3 + $0x2b8] ss:$12 sps:$4 sm:$0xff]   ;;  %v5355_v43 = vld [vmem:[#allocation3 + $0x2d0] ss:$12 sps:$4 sm:$0xff]  }
  0xad   :  { %2657 = vmatprep.subr.bf16.mxu0 %v5301_v47  ;;  %2996 = vmatprep.subr.bf16.mxu1 %v5304_v49  ;;  %v417_v47 = vrot.slane %v5215_v24, %v5873_v54  ;;  %v1112_v49 = vrot.slane %v5351_v40, %v5873_v54  ;;  %v1126_v50 = vrot.slane %v5353_v42, %v5873_v54  ;;  %v5392_v40 = vld [vmem:[#allocation6 + $0x44c] ss:$16 sps:$4 sm:$0xff]  }
  0xae   :  { %v1166_v51 = vrot.slane %v5355_v43, %v5873_v54  ;;  %v539_v24 = vrot.slane %v5386_v17, %v5873_v54 }
  0xaf   :  { %2601 = vmatmul.mubr.bf16.gmra.mrb[16].mxu0 %v1330_v55  ;;  %2940 = vmatmul.mubr.bf16.gmra.mrb[16].mxu1 %v1330_v55  ;;  %v1180_v55 = vrot.slane %v5357_v44, %v5873_v54  ;;  %v1134_v58 = vcombine.low %v1112_v49, %v1126_v50  ;;  %v435_v0 = vcombine.high %v417_v47, %v431_v52 }
  0xb0   :  { %2658 = vmatpush1.bf16.msra.mxu0 %v5299_v56  ;;  %2997 = vmatpush1.bf16.msra.mxu1 %v5302_v57  ;;  %v5348_v56 = vld [vmem:[#allocation6 + $0x3a8] ss:$16 sps:$4 sm:$0xff]   ;;  %v1135_v57 = vcombine.high %v1112_v49, %v1126_v50  ;;  %v434_v11 = vcombine.low %v417_v47, %v431_v52  ;;  %v5398_v52 = vld [vmem:[#allocation6 + $0x46c] ss:$16 sps:$4 sm:$0xff]  }
  0xb1   :  { %2659 = vmatprep.subr.bf16.mxu0 %v5307_v60  ;;  %2998 = vmatprep.subr.bf16.mxu1 %v5310_v63  ;;  %v1189_v59 = vcombine.high %v1166_v51, %v1180_v55  ;;  %v1188_v60 = vcombine.low %v1166_v51, %v1180_v55  ;;  %v381_v63 = vcombine.high %v363_v45, %v377_v46  ;;  %v5390_v47 = vld [vmem:[#allocation6 + $0x448] ss:$16 sps:$4 sm:$0xff]   ;;  %v5395_v51 = vld [vmem:[#allocation6 + $0x464] ss:$16 sps:$4 sm:$0xff]  }
  0xb2   :  { %2610 = vmatprep.mubr.bf16.mxu0 %v1337_v8  ;;  %2949 = vmatprep.mubr.bf16.mxu1 %v1337_v8  ;;  %v5368_v8 = vld [vmem:[#allocation6 + $0x3e8] ss:$16 sps:$4 sm:$0xff]  }
  0xb3   :  { %v5416_v55 = vld [vmem:[#allocation3 + $0x13c] ss:$12 sps:$4 sm:$0xff]  }
  0xb4   :  { %2660 = vmatpush1.bf16.msra.mxu0 %v5305_v1  ;;  %2999 = vmatpush1.bf16.msra.mxu1 %v5308_v2  ;;  %v1349_v1 = vpack.c.bf16 %v1189_v59, %v1135_v57  ;;  %v1348_v2 = vpack.c.bf16 %v1188_v60, %v1134_v58  ;;  %v5417_v58 = vld [vmem:[#allocation3 + $0x154] ss:$12 sps:$4 sm:$0xff]   ;;  %v5418_v59 = vld [vmem:[#allocation3 + $0x16c] ss:$12 sps:$4 sm:$0xff]  }
  0xb5   :  { %2661 = vmatprep.subr.bf16.mxu0 %v5321_v6  ;;  %3000 = vmatprep.subr.bf16.mxu1 %v5324_v7  ;;  %v5370_v6 = vld [vmem:[#allocation6 + $0x3ec] ss:$16 sps:$4 sm:$0xff]   ;;  %v5365_v7 = vld [vmem:[#allocation6 + $0x3e0] ss:$16 sps:$4 sm:$0xff]  }
  0xb6   :  { %v5393_v60 = vld [vmem:[#allocation6 + $0x460] ss:$16 sps:$4 sm:$0xff]  }
  0xb7   :  { %2611 = vmatmul.mubr.bf16.gmra.mrb[20].mxu0 %v1336_v12  ;;  %2950 = vmatmul.mubr.bf16.gmra.mrb[20].mxu1 %v1336_v12  ;;  %v5373_v12 = vld [vmem:[#allocation6 + $0x404] ss:$16 sps:$4 sm:$0xff]  }
  0xb8   :  { %2662 = vmatpush1.bf16.msra.mxu0 %v5319_v9  ;;  %3001 = vmatpush1.bf16.msra.mxu1 %v5322_v10  ;;  %v1309_v9 = vpack.c.bf16 %v435_v0, %v381_v63  ;;  %v380_v10 = vcombine.low %v363_v45, %v377_v46  ;;  %v5387_v46 = vld [vmem:[#allocation6 + $0x440] ss:$16 sps:$4 sm:$0xff]   ;;  %v701_v0 = vrot.slane %v5416_v55, %v5873_v54  ;;  %v5464_v55 = vld [vmem:[#allocation3 + $0x25c] ss:$12 sps:$4 sm:$0xff]  }
  0xb9   :  { %2663 = vmatprep.subr.bf16.mxu0 %v5327_v16  ;;  %3002 = vmatprep.subr.bf16.mxu1 %v5330_v18  ;;  %v5385_v16 = vld [vmem:[#allocation3 + $0x94] ss:$12 sps:$4 sm:$0xff]   ;;  %v471_v18 = vrot.slane %v5383_v14, %v5873_v54 }
  0xba   :  { %2620 = vmatprep.mubr.bf16.mxu0 %v1343_v33  ;;  %2959 = vmatprep.mubr.bf16.mxu1 %v1343_v33  ;;  %v525_v20 = vrot.slane %v5385_v16, %v5873_v54  ;;  %v1308_v21 = vpack.c.bf16 %v434_v11, %v380_v10  ;;  %v5411_v10 = vld [vmem:[#allocation6 + $0x4a4] ss:$16 sps:$4 sm:$0xff]   ;;  %v5414_v11 = vld [vmem:[#allocation6 + $0x4ac] ss:$16 sps:$4 sm:$0xff]  }
  0xbb   :  { %v488_v33 = vcombine.low %v471_v18, %v485_v19  ;;  %v5433_v14 = vld [vmem:[#allocation3 + $0x1b4] ss:$12 sps:$4 sm:$0xff]  }
  0xbc   :  { %2664 = vmatpush1.bf16.msra.mxu0 %v5325_v25  ;;  %3003 = vmatpush1.bf16.msra.mxu1 %v5328_v26  ;;  %v5379_v25 = vld [vmem:[#allocation6 + $0x424] ss:$16 sps:$4 sm:$0xff]   ;;  %v489_v26 = vcombine.high %v471_v18, %v485_v19  ;;  %v543_v28 = vcombine.high %v525_v20, %v539_v24  ;;  %v849_v19 = vrot.slane %v5433_v14, %v5873_v54 }
  0xbd   :  { %2665 = vmatprep.subr.bf16.mxu0 %v5341_v32  ;;  %3004 = vmatprep.subr.bf16.mxu1 %v5344_v34  ;;  %v542_v34 = vcombine.low %v525_v20, %v539_v24  ;;  %v5409_v20 = vld [vmem:[#allocation6 + $0x4a0] ss:$16 sps:$4 sm:$0xff]   ;;  %v863_v24 = vrot.slane %v5434_v15, %v5873_v54 }
  0xbe   :  { %v1315_v32 = vpack.c.bf16 %v543_v28, %v489_v26  ;;  %v5424_v26 = vld [vmem:[#allocation6 + $0x4cc] ss:$16 sps:$4 sm:$0xff]   ;;  %v5422_v28 = vld [vmem:[#allocation6 + $0x4c8] ss:$16 sps:$4 sm:$0xff]  }
  0xbf   :  { %2621 = vmatmul.mubr.bf16.gmra.mrb[24].mxu0 %v1342_v37  ;;  %2960 = vmatmul.mubr.bf16.gmra.mrb[24].mxu1 %v1342_v37  ;;  %v5402_v37 = vld [vmem:[#allocation3 + $0x10c] ss:$12 sps:$4 sm:$0xff]   ;;  %v1314_v45 = vpack.c.bf16 %v542_v34, %v488_v33  ;;  %v5448_v33 = vld [vmem:[#allocation3 + $0x1fc] ss:$12 sps:$4 sm:$0xff]   ;;  %v5449_v34 = vld [vmem:[#allocation3 + $0x214] ss:$12 sps:$4 sm:$0xff]  }
  0xc0   :  { %2666 = vmatpush1.bf16.msra.mxu0 %v5339_v35  ;;  %3005 = vmatpush1.bf16.msra.mxu1 %v5342_v36  ;;  %v5400_v35 = vld [vmem:[#allocation3 + $0xdc] ss:$12 sps:$4 sm:$0xff]   ;;  %v5401_v36 = vld [vmem:[#allocation3 + $0xf4] ss:$12 sps:$4 sm:$0xff]   ;;  %v647_v44 = vrot.slane %v5402_v37, %v5873_v54 }
  0xc1   :  { %2667 = vmatprep.subr.bf16.mxu0 %v5347_v38  ;;  %3006 = vmatprep.subr.bf16.mxu1 %v5350_v39  ;;  %v5389_v38 = vld [vmem:[#allocation6 + $0x444] ss:$16 sps:$4 sm:$0xff]   ;;  %v579_v39 = vrot.slane %v5399_v31, %v5873_v54  ;;  %v593_v42 = vrot.slane %v5400_v35, %v5873_v54  ;;  %v633_v43 = vrot.slane %v5401_v36, %v5873_v54  ;;  %v5450_v35 = vld [vmem:[#allocation3 + $0x22c] ss:$12 sps:$4 sm:$0xff]  }
  0xc2   :  { %2630 = vmatprep.mubr.bf16.mxu0 %v1349_v1  ;;  %2969 = vmatprep.mubr.bf16.mxu1 %v1349_v1  ;;  %v5405_v1 = vld [vmem:[#allocation6 + $0x484] ss:$16 sps:$4 sm:$0xff]  }
  0xc3   :  { %v597_v49 = vcombine.high %v579_v39, %v593_v42  ;;  %v651_v50 = vcombine.high %v633_v43, %v647_v44  ;;  %v596_v57 = vcombine.low %v579_v39, %v593_v42  ;;  %v5447_v31 = vld [vmem:[#allocation3 + $0x1e4] ss:$12 sps:$4 sm:$0xff]   ;;  %v917_v39 = vrot.slane %v5448_v33, %v5873_v54 }
  0xc4   :  { %2668 = vmatpush1.bf16.msra.mxu0 %v5345_v53  ;;  %3007 = vmatpush1.bf16.msra.mxu1 %v5348_v56  ;;  %v5415_v53 = vld [vmem:[#allocation3 + $0x124] ss:$12 sps:$4 sm:$0xff]   ;;  %v5928_v37 = vrot.slane %v5447_v31, %v5873_v54  ;;  %v971_v42 = vrot.slane %v5450_v35, %v5873_v54  ;;  %v5472_v31 = vld [vmem:[#allocation6 + $0x58c] ss:$16 sps:$4 sm:$0xff]  }
  0xc5   :  { %2669 = vmatprep.subr.bf16.mxu0 %v5361_v61  ;;  %3008 = vmatprep.subr.bf16.mxu1 %v5364_v62  ;;  %v1321_v56 = vpack.c.bf16 %v651_v50, %v597_v49  ;;  %v5396_v61 = vld [vmem:[#allocation6 + $0x468] ss:$16 sps:$4 sm:$0xff]   ;;  %v650_v62 = vcombine.low %v633_v43, %v647_v44  ;;  %v687_v63 = vrot.slane %v5415_v53, %v5873_v54  ;;  %v5427_v36 = vld [vmem:[#allocation6 + $0x4e4] ss:$16 sps:$4 sm:$0xff]   ;;  %v5425_v44 = vld [vmem:[#allocation6 + $0x4e0] ss:$16 sps:$4 sm:$0xff]  }
  0xc6   :  { %v5437_v49 = vld [vmem:[#allocation6 + $0x504] ss:$16 sps:$4 sm:$0xff]   ;;  %v5440_v50 = vld [vmem:[#allocation6 + $0x50c] ss:$16 sps:$4 sm:$0xff]  }
  0xc7   :  { %2631 = vmatmul.mubr.bf16.gmra.mrb[28].mxu0 %v1348_v2  ;;  %2970 = vmatmul.mubr.bf16.gmra.mrb[28].mxu1 %v1348_v2  ;;  %v741_v2 = vrot.slane %v5417_v58, %v5873_v54  ;;  %v5463_v53 = vld [vmem:[#allocation3 + $0x244] ss:$12 sps:$4 sm:$0xff]   ;;  %v5496_v35 = vld [vmem:[#allocation3 + $0x20] ss:$12 sps:$4 sm:$0xff]  }
  0xc8   :  { %2670 = vmatpush1.bf16.msra.mxu0 %v5359_v3  ;;  %3009 = vmatpush1.bf16.msra.mxu1 %v5362_v4  ;;  %v755_v3 = vrot.slane %v5418_v59, %v5873_v54  ;;  %v5408_v4 = vld [vmem:[#allocation6 + $0x48c] ss:$16 sps:$4 sm:$0xff]   ;;  %v5435_v59 = vld [vmem:[#allocation6 + $0x500] ss:$16 sps:$4 sm:$0xff]  }
  0xc9   :  { %2671 = vmatprep.subr.bf16.mxu0 %v5367_v5  ;;  %3010 = vmatprep.subr.bf16.mxu1 %v5370_v6  ;;  %v5403_v5 = vld [vmem:[#allocation6 + $0x480] ss:$16 sps:$4 sm:$0xff]   ;;  %v5406_v6 = vld [vmem:[#allocation6 + $0x488] ss:$16 sps:$4 sm:$0xff]  }
  0xca   :  { %2673 = vmatprep.mubr.bf16.mxu0 %v1309_v9  ;;  %3012 = vmatprep.mubr.bf16.mxu1 %v1309_v9  ;;  %v1320_v9 = vpack.c.bf16 %v650_v62, %v596_v57  ;;  %v5466_v57 = vld [vmem:[#allocation3 + $0x28c] ss:$12 sps:$4 sm:$0xff]  }
  0xcb   :  { %v5446_v62 = vld [vmem:[#allocation6 + $0x52c] ss:$16 sps:$4 sm:$0xff]  }
  0xcc   :  { %2672 = vmatpush1.bf16.msra.mxu0 %v5365_v7  ;;  %3011 = vmatpush1.bf16.msra.mxu1 %v5368_v8  ;;  %v705_v7 = vcombine.high %v687_v63, %v701_v0  ;;  %v759_v8 = vcombine.high %v741_v2, %v755_v3 }
  0xcd   :  { %2754 = vmatprep.subr.bf16.mxu0 %v5373_v12  ;;  %3093 = vmatprep.subr.bf16.mxu1 %v5376_v13  ;;  %v5431_v12 = vld [vmem:[#allocation3 + $0x184] ss:$12 sps:$4 sm:$0xff]   ;;  %v5432_v13 = vld [vmem:[#allocation3 + $0x19c] ss:$12 sps:$4 sm:$0xff]  }
  0xce   :  { %v1327_v16 = vpack.c.bf16 %v759_v8, %v705_v7  ;;  %v795_v17 = vrot.slane %v5431_v12, %v5873_v54  ;;  %v809_v18 = vrot.slane %v5432_v13, %v5873_v54  ;;  %v5453_v8 = vld [vmem:[#allocation6 + $0x544] ss:$16 sps:$4 sm:$0xff]   ;;  %v5482_v13 = vld [vmem:[#allocation3 + $0x2ec] ss:$12 sps:$4 sm:$0xff]  }
  0xcf   :  { %2674 = vmatmul.mubr.bf16.vlgmr.msra.gmra.mrb[0].mxu0 %v1308_v21  ;;  %3013 = vmatmul.mubr.bf16.vlgmr.msra.gmra.mrb[0].mxu1 %v1308_v21  ;;  %v5412_v21 = vld [vmem:[#allocation6 + $0x4a8] ss:$16 sps:$4 sm:$0xff]   ;;  %v5481_v12 = vld [vmem:[#allocation3 + $0x2d4] ss:$12 sps:$4 sm:$0xff]  }
  0xd0   :  { %2755 = vmatpush1.bf16.msra.mxu0 %v5371_v22  ;;  %3094 = vmatpush1.bf16.msra.mxu1 %v5374_v23  ;;  %v704_v22 = vcombine.low %v687_v63, %v701_v0  ;;  %v758_v23 = vcombine.low %v741_v2, %v755_v3  ;;  %v5441_v0 = vld [vmem:[#allocation6 + $0x520] ss:$16 sps:$4 sm:$0xff]   ;;  %v1011_v2 = vrot.slane %v5463_v53, %v5873_v54 }
  0xd1   :  { %2756 = vmatprep.subr.bf16.mxu0 %v5379_v25  ;;  %3095 = vmatprep.subr.bf16.mxu1 %v5382_v27  ;;  %v5421_v25 = vld [vmem:[#allocation6 + $0x4c4] ss:$16 sps:$4 sm:$0xff]   ;;  %v5419_v27 = vld [vmem:[#allocation6 + $0x4c0] ss:$16 sps:$4 sm:$0xff]   ;;  %v1025_v3 = vrot.slane %v5464_v55, %v5873_v54 }
  0xd2   :  { %2683 = vmatprep.mubr.bf16.mxu0 %v1315_v32  ;;  %3022 = vmatprep.mubr.bf16.mxu1 %v1315_v32  ;;  %v1326_v32 = vpack.c.bf16 %v758_v23, %v704_v22  ;;  %v1173_v23 = vrot.slane %v5481_v12, %v5873_v54  ;;  %v5500_v53 = vld [vmem:[#allocation3 + $0x80] ss:$12 sps:$4 sm:$0xff]   ;;  %v5501_v55 = vld [vmem:[#allocation3 + $0x98] ss:$12 sps:$4 sm:$0xff]  }
  0xd3   :  { %v1029_v14 = vcombine.high %v1011_v2, %v1025_v3 }
  0xd4   :  { %2757 = vmatpush1.bf16.msra.mxu0 %v5377_v29  ;;  %3096 = vmatpush1.bf16.msra.mxu1 %v5380_v30  ;;  %v813_v29 = vcombine.high %v795_v17, %v809_v18  ;;  %v867_v30 = vcombine.high %v849_v19, %v863_v24 }
  0xd5   :  { %2758 = vmatprep.subr.bf16.mxu0 %v5389_v38  ;;  %3097 = vmatprep.subr.bf16.mxu1 %v5392_v40  ;;  %v5430_v38 = vld [vmem:[#allocation6 + $0x4ec] ss:$16 sps:$4 sm:$0xff]   ;;  %v957_v40 = vrot.slane %v5449_v34, %v5873_v54  ;;  %v5495_v34 = vld [vmem:[#allocation3 + $0x8] ss:$12 sps:$4 sm:$0xff]  }
  0xd6   :  { %v1333_v43 = vpack.c.bf16 %v867_v30, %v813_v29  ;;  %v5469_v30 = vld [vmem:[#allocation6 + $0x584] ss:$16 sps:$4 sm:$0xff]  }
  0xd7   :  { %2684 = vmatmul.mubr.bf16.gmra.mrb[4].mxu0 %v1314_v45  ;;  %3023 = vmatmul.mubr.bf16.gmra.mrb[4].mxu1 %v1314_v45  ;;  %v5428_v45 = vld [vmem:[#allocation6 + $0x4e8] ss:$16 sps:$4 sm:$0xff]   ;;  %v974_v7 = vcombine.low %v957_v40, %v971_v42 }
  0xd8   :  { %2759 = vmatpush1.bf16.msra.mxu0 %v5387_v46  ;;  %3098 = vmatpush1.bf16.msra.mxu1 %v5390_v47  ;;  %v812_v46 = vcombine.low %v795_v17, %v809_v18  ;;  %v866_v47 = vcombine.low %v849_v19, %v863_v24  ;;  %v5451_v17 = vld [vmem:[#allocation6 + $0x540] ss:$16 sps:$4 sm:$0xff]   ;;  %v5454_v18 = vld [vmem:[#allocation6 + $0x548] ss:$16 sps:$4 sm:$0xff]   ;;  %v5459_v19 = vld [vmem:[#allocation6 + $0x564] ss:$16 sps:$4 sm:$0xff]   ;;  %v1187_v24 = vrot.slane %v5482_v13, %v5873_v54 }
  0xd9   :  { %2760 = vmatprep.subr.bf16.mxu0 %v5395_v51  ;;  %3099 = vmatprep.subr.bf16.mxu1 %v5398_v52  ;;  %v921_v51 = vcombine.high %v5928_v37, %v917_v39  ;;  %v975_v52 = vcombine.high %v957_v40, %v971_v42  ;;  %v5475_v42 = vld [vmem:[#allocation6 + $0x5a4] ss:$16 sps:$4 sm:$0xff]  }
  0xda   :  { %2693 = vmatprep.mubr.bf16.mxu0 %v1321_v56  ;;  %3032 = vmatprep.mubr.bf16.mxu1 %v1321_v56  ;;  %v5465_v56 = vld [vmem:[#allocation3 + $0x274] ss:$12 sps:$4 sm:$0xff]   ;;  %v1332_v58 = vpack.c.bf16 %v866_v47, %v812_v46  ;;  %v1191_v33 = vcombine.high %v1173_v23, %v1187_v24  ;;  %v5476_v47 = vld [vmem:[#allocation6 + $0x5a8] ss:$16 sps:$4 sm:$0xff]  }
  0xdb   :  { %v1339_v63 = vpack.c.bf16 %v975_v52, %v921_v51  ;;  %v5473_v46 = vld [vmem:[#allocation6 + $0x5a0] ss:$16 sps:$4 sm:$0xff]   ;;  %v5505_v13 = vld [vmem:[#allocation3 + $0xf8] ss:$12 sps:$4 sm:$0xff]  }
  0xdc   :  { %2761 = vmatpush1.bf16.msra.mxu0 %v5393_v60  ;;  %3100 = vmatpush1.bf16.msra.mxu1 %v5396_v61  ;;  %v5438_v60 = vld [vmem:[#allocation6 + $0x508] ss:$16 sps:$4 sm:$0xff]   ;;  %v5443_v61 = vld [vmem:[#allocation6 + $0x524] ss:$16 sps:$4 sm:$0xff]  }
  0xdd   :  { %2762 = vmatprep.subr.bf16.mxu0 %v5405_v1  ;;  %3101 = vmatprep.subr.bf16.mxu1 %v5408_v4  ;;  %v5444_v1 = vld [vmem:[#allocation6 + $0x528] ss:$16 sps:$4 sm:$0xff]   ;;  %v1065_v4 = vrot.slane %v5465_v56, %v5873_v54  ;;  %v5502_v56 = vld [vmem:[#allocation3 + $0xb0] ss:$12 sps:$4 sm:$0xff]  }
  0xdf   :  { %2694 = vmatmul.mubr.bf16.gmra.mrb[8].mxu0 %v1320_v9  ;;  %3033 = vmatmul.mubr.bf16.gmra.mrb[8].mxu1 %v1320_v9  ;;  %v5456_v9 = vld [vmem:[#allocation6 + $0x54c] ss:$16 sps:$4 sm:$0xff]  }
  0xe0   :  { %2763 = vmatpush1.bf16.msra.mxu0 %v5403_v5  ;;  %3102 = vmatpush1.bf16.msra.mxu1 %v5406_v6  ;;  %v1079_v5 = vrot.slane %v5466_v57, %v5873_v54  ;;  %v920_v6 = vcombine.low %v5928_v37, %v917_v39  ;;  %v5470_v37 = vld [vmem:[#allocation6 + $0x588] ss:$16 sps:$4 sm:$0xff]   ;;  %v5498_v39 = vld [vmem:[#allocation3 + $0x50] ss:$12 sps:$4 sm:$0xff]  }
  0xe1   :  { %2764 = vmatprep.subr.bf16.mxu0 %v5411_v10  ;;  %3103 = vmatprep.subr.bf16.mxu1 %v5414_v11  ;;  %v5479_v10 = vld [vmem:[#allocation3 + $0x2a4] ss:$12 sps:$4 sm:$0xff]   ;;  %v5480_v11 = vld [vmem:[#allocation3 + $0x2bc] ss:$12 sps:$4 sm:$0xff]   ;;  %v451_v52 = vrot.slane %v5498_v39, %v5873_v54 }
  0xe2   :  { %2703 = vmatprep.mubr.bf16.mxu0 %v1327_v16  ;;  %3042 = vmatprep.mubr.bf16.mxu1 %v1327_v16  ;;  %v1083_v15 = vcombine.high %v1065_v4, %v1079_v5  ;;  %v1338_v16 = vpack.c.bf16 %v974_v7, %v920_v6  ;;  %v1133_v22 = vrot.slane %v5480_v11, %v5873_v54  ;;  %v5492_v11 = vld [vmem:[#allocation6 + $0x5e8] ss:$16 sps:$4 sm:$0xff]  }
  0xe3   :  { %v1082_v29 = vcombine.low %v1065_v4, %v1079_v5  ;;  %v505_v5 = vrot.slane %v5500_v53, %v5873_v54  ;;  %v552_v6 = vrot.slane %v5501_v55, %v5873_v54  ;;  %v559_v7 = vrot.slane %v5502_v56, %v5873_v54  ;;  %v5511_v39 = vld [vmem:[#allocation3 + $0x188] ss:$12 sps:$4 sm:$0xff]  }
  0xe4   :  { %2765 = vmatpush1.bf16.msra.mxu0 %v5409_v20  ;;  %3104 = vmatpush1.bf16.msra.mxu1 %v5412_v21  ;;  %v5940_v20 = vrot.slane %v5479_v10, %v5873_v54  ;;  %v5462_v21 = vld [vmem:[#allocation6 + $0x56c] ss:$16 sps:$4 sm:$0xff]   ;;  %v5489_v10 = vld [vmem:[#allocation6 + $0x5e0] ss:$16 sps:$4 sm:$0xff]   ;;  %v822_v55 = vrot.slane %v5511_v39, %v5873_v54  ;;  %v5523_v39 = vld [vmem:[#allocation3 + $0x2a8] ss:$12 sps:$4 sm:$0xff]  }
  0xe5   :  { %2766 = vmatprep.subr.bf16.mxu0 %v5421_v25  ;;  %3105 = vmatprep.subr.bf16.mxu1 %v5424_v26  ;;  %v5457_v25 = vld [vmem:[#allocation6 + $0x560] ss:$16 sps:$4 sm:$0xff]   ;;  %v5460_v26 = vld [vmem:[#allocation6 + $0x568] ss:$16 sps:$4 sm:$0xff]  }
  0xe6   :  { %v1136_v57 = vcombine.low %v5940_v20, %v1133_v22 }
  0xe7   :  { %2704 = vmatmul.mubr.bf16.gmra.mrb[12].mxu0 %v1326_v32  ;;  %3043 = vmatmul.mubr.bf16.gmra.mrb[12].mxu1 %v1326_v32  ;;  %v1137_v32 = vcombine.high %v5940_v20, %v1133_v22 }
  0xe8   :  { %2767 = vmatpush1.bf16.msra.mxu0 %v5419_v27  ;;  %3106 = vmatpush1.bf16.msra.mxu1 %v5422_v28  ;;  %v1345_v27 = vpack.c.bf16 %v1083_v15, %v1029_v14  ;;  %v1028_v28 = vcombine.low %v1011_v2, %v1025_v3  ;;  %v5491_v2 = vld [vmem:[#allocation6 + $0x5e4] ss:$16 sps:$4 sm:$0xff]   ;;  %v5494_v3 = vld [vmem:[#allocation6 + $0x5ec] ss:$16 sps:$4 sm:$0xff]  }
  0xe9   :  { %2768 = vmatprep.subr.bf16.mxu0 %v5427_v36  ;;  %3107 = vmatprep.subr.bf16.mxu1 %v5430_v38  ;;  %v5467_v36 = vld [vmem:[#allocation6 + $0x580] ss:$16 sps:$4 sm:$0xff]   ;;  %v5497_v38 = vld [vmem:[#allocation3 + $0x38] ss:$12 sps:$4 sm:$0xff]  }
  0xea   :  { %2713 = vmatprep.mubr.bf16.mxu0 %v1333_v43  ;;  %3052 = vmatprep.mubr.bf16.mxu1 %v1333_v43  ;;  %v1344_v40 = vpack.c.bf16 %v1082_v29, %v1028_v28  ;;  %v5478_v43 = vld [vmem:[#allocation6 + $0x5ac] ss:$16 sps:$4 sm:$0xff]   ;;  %v444_v51 = vrot.slane %v5497_v38, %v5873_v54 }
  0xeb   :  { %v5506_v14 = vld [vmem:[#allocation3 + $0x110] ss:$12 sps:$4 sm:$0xff]  }
  0xec   :  { %2769 = vmatpush1.bf16.msra.mxu0 %v5425_v44  ;;  %3108 = vmatpush1.bf16.msra.mxu1 %v5428_v45  ;;  %v1351_v44 = vpack.c.bf16 %v1191_v33, %v1137_v32  ;;  %v5499_v45 = vld [vmem:[#allocation3 + $0x68] ss:$12 sps:$4 sm:$0xff]   ;;  %v5510_v28 = vld [vmem:[#allocation3 + $0x170] ss:$12 sps:$4 sm:$0xff]  }
  0xed   :  { %2770 = vmatprep.subr.bf16.mxu0 %v5437_v49  ;;  %3109 = vmatprep.subr.bf16.mxu1 %v5440_v50  ;;  %v390_v49 = vrot.slane %v5495_v34, %v5873_v54  ;;  %v397_v50 = vrot.slane %v5496_v35, %v5873_v54  ;;  %v498_v4 = vrot.slane %v5499_v45, %v5873_v54  ;;  %v5527_v45 = vld [vmem:[#allocation8] ss:$8 sps:$4 sm:$0xff]  }
  0xee   :  { %v775_v38 = vrot.slane %v5510_v28, %v5873_v54  ;;  %v5522_v28 = vld [vmem:[#allocation3 + $0x290] ss:$12 sps:$4 sm:$0xff]  }
  0xef   :  { %2714 = vmatmul.mubr.bf16.gmra.mrb[16].mxu0 %v1332_v58  ;;  %3053 = vmatmul.mubr.bf16.gmra.mrb[16].mxu1 %v1332_v58  ;;  %v1190_v58 = vcombine.low %v1173_v23, %v1187_v24  ;;  %v398_v15 = vcombine.low %v390_v49, %v397_v50  ;;  %v660_v23 = vrot.slane %v5505_v13, %v5873_v54 }
  0xf0   :  { %2771 = vmatpush1.bf16.msra.mxu0 %v5435_v59  ;;  %3110 = vmatpush1.bf16.msra.mxu1 %v5438_v60  ;;  %v5485_v59 = vld [vmem:[#allocation6 + $0x5c4] ss:$16 sps:$4 sm:$0xff]   ;;  %v5488_v60 = vld [vmem:[#allocation6 + $0x5cc] ss:$16 sps:$4 sm:$0xff]   ;;  %v667_v24 = vrot.slane %v5506_v14, %v5873_v54  ;;  %v506_v29 = vcombine.low %v498_v4, %v505_v5 }
  0xf1   :  { %2772 = vmatprep.subr.bf16.mxu0 %v5443_v61  ;;  %3111 = vmatprep.subr.bf16.mxu1 %v5446_v62  ;;  %v5483_v61 = vld [vmem:[#allocation6 + $0x5c0] ss:$16 sps:$4 sm:$0xff]   ;;  %v5486_v62 = vld [vmem:[#allocation6 + $0x5c8] ss:$16 sps:$4 sm:$0xff]  }
  0xf2   :  { %2723 = vmatprep.mubr.bf16.mxu0 %v1339_v63  ;;  %3062 = vmatprep.mubr.bf16.mxu1 %v1339_v63  ;;  %v399_v63 = vcombine.high %v390_v49, %v397_v50  ;;  %v669_v32 = vcombine.high %v660_v23, %v667_v24  ;;  %v5514_v50 = vld [vmem:[#allocation3 + $0x1d0] ss:$12 sps:$4 sm:$0xff]  }
  0xf4   :  { %2773 = vmatpush1.bf16.msra.mxu0 %v5441_v0  ;;  %3112 = vmatpush1.bf16.msra.mxu1 %v5444_v1  ;;  %v453_v0 = vcombine.high %v444_v51, %v451_v52  ;;  %v1350_v1 = vpack.c.bf16 %v1190_v58, %v1136_v57 }
  0xf5   :  { %2774 = vmatprep.subr.bf16.mxu0 %v5453_v8  ;;  %3113 = vmatprep.subr.bf16.mxu1 %v5456_v9  ;;  %v5503_v8 = vld [vmem:[#allocation3 + $0xc8] ss:$12 sps:$4 sm:$0xff]   ;;  %v5504_v9 = vld [vmem:[#allocation3 + $0xe0] ss:$12 sps:$4 sm:$0xff]  }
  0xf6   :  { %v1311_v12 = vpack.c.bf16 %v453_v0, %v399_v63  ;;  %v606_v20 = vrot.slane %v5503_v8, %v5873_v54  ;;  %v5533_v63 = vld [vmem:[#allocation8 + $0x20] ss:$8 sps:$4 sm:$0xff]  }
  0xf7   :  { %2724 = vmatmul.mubr.bf16.gmra.mrb[20].mxu0 %v1338_v16  ;;  %3063 = vmatmul.mubr.bf16.gmra.mrb[20].mxu1 %v1338_v16  ;;  %v452_v16 = vcombine.low %v444_v51, %v451_v52  ;;  %v5532_v51 = vld [vmem:[#allocation8 + $0x14] ss:$8 sps:$4 sm:$0xff]   ;;  %v5530_v52 = vld [vmem:[#allocation8 + $0x10] ss:$8 sps:$4 sm:$0xff]  }
  0xf8   :  { %2775 = vmatpush1.bf16.msra.mxu0 %v5451_v17  ;;  %3114 = vmatpush1.bf16.msra.mxu1 %v5454_v18  ;;  %v507_v17 = vcombine.high %v498_v4, %v505_v5  ;;  %v561_v18 = vcombine.high %v552_v6, %v559_v7 }
  0xf9   :  { %2776 = vmatprep.subr.bf16.mxu0 %v5459_v19  ;;  %3115 = vmatprep.subr.bf16.mxu1 %v5462_v21  ;;  %v1310_v19 = vpack.c.bf16 %v452_v16, %v398_v15  ;;  %v613_v21 = vrot.slane %v5504_v9, %v5873_v54  ;;  %v5539_v16 = vld [vmem:[#allocation8 + $0x40] ss:$8 sps:$4 sm:$0xff]  }
  0xfa   :  { %2733 = vmatprep.mubr.bf16.mxu0 %v1345_v27  ;;  %3072 = vmatprep.mubr.bf16.mxu1 %v1345_v27  ;;  %v1317_v22 = vpack.c.bf16 %v561_v18, %v507_v17  ;;  %v5509_v27 = vld [vmem:[#allocation3 + $0x158] ss:$12 sps:$4 sm:$0xff]   ;;  %v5519_v17 = vld [vmem:[#allocation3 + $0x248] ss:$12 sps:$4 sm:$0xff]  }
  0xfb   :  { %v5541_v18 = vld [vmem:[#allocation8 + $0x44] ss:$8 sps:$4 sm:$0xff]  }
  0xfc   :  { %2777 = vmatpush1.bf16.msra.mxu0 %v5457_v25  ;;  %3116 = vmatpush1.bf16.msra.mxu1 %v5460_v26  ;;  %v5507_v25 = vld [vmem:[#allocation3 + $0x128] ss:$12 sps:$4 sm:$0xff]   ;;  %v5508_v26 = vld [vmem:[#allocation3 + $0x140] ss:$12 sps:$4 sm:$0xff]  }
  0xfd   :  { %2778 = vmatprep.subr.bf16.mxu0 %v5469_v30  ;;  %3117 = vmatprep.subr.bf16.mxu1 %v5472_v31  ;;  %v560_v30 = vcombine.low %v552_v6, %v559_v7  ;;  %v615_v31 = vcombine.high %v606_v20, %v613_v21  ;;  %v714_v34 = vrot.slane %v5507_v25, %v5873_v54  ;;  %v5518_v6 = vld [vmem:[#allocation3 + $0x230] ss:$12 sps:$4 sm:$0xff]  }
  0xfe   :  { %v5536_v7 = vld [vmem:[#allocation8 + $0x30] ss:$8 sps:$4 sm:$0xff]   ;;  %v5981_v15 = vrot.slane %v5518_v6, %v5873_v54  ;;  %v5544_v25 = vld [vmem:[#allocation8 + $0x54] ss:$8 sps:$4 sm:$0xff]  }
  0xff   :  { %2734 = vmatmul.mubr.bf16.gmra.mrb[24].mxu0 %v1344_v40  ;;  %3073 = vmatmul.mubr.bf16.gmra.mrb[24].mxu1 %v1344_v40  ;;  %v1316_v33 = vpack.c.bf16 %v560_v30, %v506_v29  ;;  %v1323_v35 = vpack.c.bf16 %v669_v32, %v615_v31  ;;  %v5512_v40 = vld [vmem:[#allocation3 + $0x1a0] ss:$12 sps:$4 sm:$0xff]   ;;  %v5542_v30 = vld [vmem:[#allocation8 + $0x50] ss:$8 sps:$4 sm:$0xff]  }
 0x100   :  { %2779 = vmatpush1.bf16.msra.mxu0 %v5467_v36  ;;  %3118 = vmatpush1.bf16.msra.mxu1 %v5470_v37  ;;  %v721_v36 = vrot.slane %v5508_v26, %v5873_v54  ;;  %v768_v37 = vrot.slane %v5509_v27, %v5873_v54  ;;  %v829_v57 = vrot.slane %v5512_v40, %v5873_v54  ;;  %v5994_v29 = vld [vmem:[#allocation8 + $0x124] ss:$8 sps:$4 sm:$0xff]   ;;  %v5997_v31 = vld [vmem:[#allocation8 + $0x120] ss:$8 sps:$4 sm:$0xff]   ;;  %v6004_v40 = vld [vmem:[#allocation8 + $0x134] ss:$8 sps:$4 sm:$0xff]  }
 0x101   :  { %2780 = vmatprep.subr.bf16.mxu0 %v5475_v42  ;;  %3119 = vmatprep.subr.bf16.mxu1 %v5478_v43  ;;  %v5513_v42 = vld [vmem:[#allocation3 + $0x1b8] ss:$12 sps:$4 sm:$0xff]   ;;  %v614_v43 = vcombine.low %v606_v20, %v613_v21  ;;  %v5987_v21 = vld [vmem:[#allocation8 + $0x114] ss:$8 sps:$4 sm:$0xff]  }
 0x102   :  { %2743 = vmatprep.mubr.bf16.mxu0 %v1351_v44  ;;  %3082 = vmatprep.mubr.bf16.mxu1 %v1351_v44  ;;  %v668_v44 = vcombine.low %v660_v23, %v667_v24  ;;  %v777_v49 = vcombine.high %v768_v37, %v775_v38  ;;  %v876_v58 = vrot.slane %v5513_v42, %v5873_v54  ;;  %v5985_v20 = vld [vmem:[#allocation8 + $0x110] ss:$8 sps:$4 sm:$0xff]   ;;  %v5524_v42 = vld [vmem:[#allocation3 + $0x2c0] ss:$12 sps:$4 sm:$0xff]  }
 0x103   :  { %v722_v0 = vcombine.low %v714_v34, %v721_v36  ;;  %v831_v4 = vcombine.high %v822_v55, %v829_v57  ;;  %v5521_v24 = vld [vmem:[#allocation3 + $0x278] ss:$12 sps:$4 sm:$0xff]  }
 0x104   :  { %2781 = vmatpush1.bf16.msra.mxu0 %v5473_v46  ;;  %3120 = vmatpush1.bf16.msra.mxu1 %v5476_v47  ;;  %v5529_v46 = vld [vmem:[#allocation8 + $0x4] ss:$8 sps:$4 sm:$0xff]   ;;  %v723_v47 = vcombine.high %v714_v34, %v721_v36  ;;  %v1322_v53 = vpack.c.bf16 %v668_v44, %v614_v43  ;;  %v1092_v36 = vrot.slane %v5521_v24, %v5873_v54  ;;  %v5545_v44 = vld [vmem:[#allocation8 + $0x60] ss:$8 sps:$4 sm:$0xff]   ;;  %v5581_v24 = vld [vmem:[#allocation8 + $0xd0] ss:$8 sps:$4 sm:$0xff]  }
 0x105   :  { %2782 = vmatprep.subr.bf16.mxu0 %v5485_v59  ;;  %3121 = vmatprep.subr.bf16.mxu1 %v5488_v60  ;;  %v883_v59 = vrot.slane %v5514_v50, %v5873_v54  ;;  %v5515_v60 = vld [vmem:[#allocation3 + $0x1e8] ss:$12 sps:$4 sm:$0xff]   ;;  %v5525_v43 = vld [vmem:[#allocation3 + $0x2d8] ss:$12 sps:$4 sm:$0xff]  }
 0x106   :  { %v1329_v56 = vpack.c.bf16 %v777_v49, %v723_v47  ;;  %v5968_v9 = vrot.slane %v5515_v60, %v5873_v54  ;;  %v5550_v49 = vld [vmem:[#allocation8 + $0x74] ss:$8 sps:$4 sm:$0xff]   ;;  %v6013_v50 = vld [vmem:[#allocation8 + $0x144] ss:$8 sps:$4 sm:$0xff]  }
 0x107   :  { %2744 = vmatmul.mubr.bf16.gmra.mrb[28].mxu0 %v1350_v1  ;;  %3083 = vmatmul.mubr.bf16.gmra.mrb[28].mxu1 %v1350_v1  ;;  %v776_v1 = vcombine.low %v768_v37, %v775_v38  ;;  %v885_v5 = vcombine.high %v876_v58, %v883_v59  ;;  %v884_v23 = vcombine.low %v876_v58, %v883_v59  ;;  %v5547_v38 = vld [vmem:[#allocation8 + $0x64] ss:$8 sps:$4 sm:$0xff]   ;;  %v6021_v60 = vld [vmem:[#allocation8 + $0x154] ss:$8 sps:$4 sm:$0xff]  }
 0x108   :  { %2783 = vmatpush1.bf16.msra.mxu0 %v5483_v61  ;;  %3122 = vmatpush1.bf16.msra.mxu1 %v5486_v62  ;;  %v5535_v61 = vld [vmem:[#allocation8 + $0x24] ss:$8 sps:$4 sm:$0xff]   ;;  %v1099_v37 = vrot.slane %v5522_v28, %v5873_v54  ;;  %v1146_v58 = vrot.slane %v5523_v39, %v5873_v54  ;;  %v6033_v28 = vld [vmem:[#allocation8 + $0x160] ss:$8 sps:$4 sm:$0xff]  }
 0x109   :  { %2784 = vmatprep.subr.bf16.mxu0 %v5491_v2  ;;  %3123 = vmatprep.subr.bf16.mxu1 %v5494_v3  ;;  %v5516_v62 = vld [vmem:[#allocation3 + $0x200] ss:$12 sps:$4 sm:$0xff]   ;;  %v5517_v2 = vld [vmem:[#allocation3 + $0x218] ss:$12 sps:$4 sm:$0xff]   ;;  %v5538_v3 = vld [vmem:[#allocation8 + $0x34] ss:$8 sps:$4 sm:$0xff]   ;;  %v1328_v8 = vpack.c.bf16 %v776_v1, %v722_v0 }
 0x10a   :  { %2786 = vmatprep.mubr.bf16.mxu0 %v1311_v12  ;;  %3125 = vmatprep.mubr.bf16.mxu1 %v1311_v12  ;;  %v1335_v12 = vpack.c.bf16 %v885_v5, %v831_v4  ;;  %v5975_v13 = vrot.slane %v5516_v62, %v5873_v54  ;;  %v5978_v14 = vrot.slane %v5517_v2, %v5873_v54  ;;  %v5553_v59 = vld [vmem:[#allocation8 + $0x84] ss:$8 sps:$4 sm:$0xff]   ;;  %v5551_v1 = vld [vmem:[#allocation8 + $0x80] ss:$8 sps:$4 sm:$0xff]   ;;  %v6026_v2 = vld [vmem:[#allocation8 + $0x150] ss:$8 sps:$4 sm:$0xff]  }
 0x10b   :  { %v1153_v62 = vrot.slane %v5524_v42, %v5873_v54  ;;  %v1100_v5 = vcombine.low %v1092_v36, %v1099_v37  ;;  %v6056_v39 = vld [vmem:[#allocation8 + $0x1a4] ss:$8 sps:$4 sm:$0xff]   ;;  %v6058_v42 = vld [vmem:[#allocation8 + $0x1a0] ss:$8 sps:$4 sm:$0xff]  }
 0x10c   :  { %2785 = vmatpush1.bf16.msra.mxu0 %v5489_v10  ;;  %3124 = vmatpush1.bf16.msra.mxu1 %v5492_v11  ;;  %v5970_v10 = vld [vmem:[#allocation8 + $0x100] ss:$8 sps:$4 sm:$0xff]   ;;  %v5972_v11 = vld [vmem:[#allocation8 + $0x104] ss:$8 sps:$4 sm:$0xff]   ;;  %v939_v26 = vcombine.high %v5968_v9, %v5975_v13  ;;  %v993_v27 = vcombine.high %v5978_v14, %v5981_v15  ;;  %v992_v47 = vcombine.low %v5978_v14, %v5981_v15  ;;  %v5571_v14 = vld [vmem:[#allocation8 + $0xb4] ss:$8 sps:$4 sm:$0xff]  }
 0x10d   :  { %3698 = vmatprep.subr.bf16.mxu0 %v5529_v46  ;;  %4809 = vmatprep.subr.bf16.mxu1 %v5972_v11  ;;  %v938_v46 = vcombine.low %v5968_v9, %v5975_v13  ;;  %v1155_v6 = vcombine.high %v1146_v58, %v1153_v62  ;;  %v5565_v9 = vld [vmem:[#allocation8 + $0xa4] ss:$8 sps:$4 sm:$0xff]   ;;  %v5563_v13 = vld [vmem:[#allocation8 + $0xa0] ss:$8 sps:$4 sm:$0xff]   ;;  %v1154_v15 = vcombine.low %v1146_v58, %v1153_v62  ;;  %v1558_v58 = vsub.s32 2, %v5870_v48 }
 0x10e   :  { %v1341_v34 = vpack.c.bf16 %v993_v27, %v939_v26  ;;  %v6031_v26 = vld [vmem:[#allocation8 + $0x164] ss:$8 sps:$4 sm:$0xff]   ;;  %v5587_v27 = vld [vmem:[#allocation8 + $0xe0] ss:$8 sps:$4 sm:$0xff]   ;;  %v1562_v62 = vsub.s32 3, %v5870_v48 }
 0x10f   :  { %2787 = vmatmul.mubr.bf16.vlgmr.msra.gmra.mrb[0].mxu0 %v1310_v19  ;;  %3126 = vmatmul.mubr.bf16.vlgmr.msra.gmra.mrb[0].mxu1 %v1310_v19  ;;  %v5520_v19 = vld [vmem:[#allocation3 + $0x260] ss:$12 sps:$4 sm:$0xff]  }
 0x110   :  { %2796 = vmatprep.mubr.bf16.mxu0 %v1317_v22  ;;  %3135 = vmatprep.mubr.bf16.mxu1 %v1317_v22  ;;  %v830_v22 = vcombine.low %v822_v55, %v829_v57  ;;  %v5548_v55 = vld [vmem:[#allocation8 + $0x70] ss:$8 sps:$4 sm:$0xff]   ;;  %v1340_v57 = vpack.c.bf16 %v992_v47, %v938_v46  ;;  %v6070_v46 = vld [vmem:[#allocation8 + $0x1c0] ss:$8 sps:$4 sm:$0xff]   ;;  %v6074_v47 = vld [vmem:[#allocation8 + $0x1d4] ss:$8 sps:$4 sm:$0xff]  }
 0x111   :  { %3699 = vmatpush1.bf16.msra.mxu0 %v5527_v45  ;;  %4825 = vmatpush1.bf16.msra.mxu1 %v5970_v10  ;;  %v6007_v45 = vld [vmem:[#allocation8 + $0x130] ss:$8 sps:$4 sm:$0xff]  }
 0x112   :  { %3700 = vmatprep.subr.bf16.mxu0 %v5532_v51  ;;  %4810 = vmatprep.subr.bf16.mxu1 %v5987_v21  ;;  %v1334_v32 = vpack.c.bf16 %v884_v23, %v830_v22  ;;  %v5575_v22 = vld [vmem:[#allocation8 + $0xc0] ss:$8 sps:$4 sm:$0xff]   ;;  %v5583_v23 = vld [vmem:[#allocation8 + $0xd4] ss:$8 sps:$4 sm:$0xff]  }
 0x115   :  { %3701 = vmatpush1.bf16.msra.mxu0 %v5530_v52  ;;  %4826 = vmatpush1.bf16.msra.mxu1 %v5985_v20  ;;  %v1101_v52 = vcombine.high %v1092_v36, %v1099_v37  ;;  %v6046_v36 = vld [vmem:[#allocation8 + $0x180] ss:$8 sps:$4 sm:$0xff]   ;;  %v6050_v37 = vld [vmem:[#allocation8 + $0x194] ss:$8 sps:$4 sm:$0xff]  }
 0x116   :  { %3702 = vmatprep.subr.bf16.mxu0 %v5535_v61  ;;  %4811 = vmatprep.subr.bf16.mxu1 %v5994_v29 }
 0x117   :  { %2797 = vmatmul.mubr.bf16.gmra.mrb[4].mxu0 %v1316_v33  ;;  %3136 = vmatmul.mubr.bf16.gmra.mrb[4].mxu1 %v1316_v33  ;;  %v1038_v33 = vrot.slane %v5519_v17, %v5873_v54  ;;  %v5569_v17 = vld [vmem:[#allocation8 + $0xb0] ss:$8 sps:$4 sm:$0xff]  }
 0x118   :  { %2806 = vmatprep.mubr.bf16.mxu0 %v1323_v35  ;;  %3145 = vmatprep.mubr.bf16.mxu1 %v1323_v35  ;;  %v1045_v35 = vrot.slane %v5520_v19, %v5873_v54  ;;  %v5577_v19 = vld [vmem:[#allocation8 + $0xc4] ss:$8 sps:$4 sm:$0xff]  }
 0x119   :  { %3703 = vmatpush1.bf16.msra.mxu0 %v5533_v63  ;;  %4827 = vmatpush1.bf16.msra.mxu1 %v5997_v31  ;;  %v1200_v63 = vrot.slane %v5525_v43, %v5873_v54  ;;  %v6064_v43 = vld [vmem:[#allocation8 + $0x1b0] ss:$8 sps:$4 sm:$0xff]  }
 0x11a   :  { %3704 = vmatprep.subr.bf16.mxu0 %v5538_v3  ;;  %v1047_v51 = vcombine.high %v1038_v33, %v1045_v35  ;;  %4812 = vmatprep.subr.bf16.mxu1 %v6004_v40  ;;  %v5559_v3 = vld [vmem:[#allocation8 + $0x94] ss:$8 sps:$4 sm:$0xff]   ;;  %v1046_v4 = vcombine.low %v1038_v33, %v1045_v35  ;;  %v5593_v33 = vld [vmem:[#allocation8 + $0xf0] ss:$8 sps:$4 sm:$0xff]   ;;  %v6044_v35 = vld [vmem:[#allocation8 + $0x184] ss:$8 sps:$4 sm:$0xff]  }
 0x11c   :  { %v1347_v61 = vpack.c.bf16 %v1101_v52, %v1047_v51  ;;  %v6080_v51 = vld [vmem:[#allocation8 + $0x1e4] ss:$8 sps:$4 sm:$0xff]   ;;  %v6082_v52 = vld [vmem:[#allocation8 + $0x1e0] ss:$8 sps:$4 sm:$0xff]  }
 0x11d   :  { %3705 = vmatpush1.bf16.msra.mxu0 %v5536_v7  ;;  %4828 = vmatpush1.bf16.msra.mxu1 %v6007_v45 }
 0x11e   :  { %3706 = vmatprep.subr.bf16.mxu0 %v5541_v18  ;;  %4813 = vmatprep.subr.bf16.mxu1 %v6013_v50 }
 0x11f   :  { %2807 = vmatmul.mubr.bf16.gmra.mrb[8].mxu0 %v1322_v53  ;;  %3146 = vmatmul.mubr.bf16.gmra.mrb[8].mxu1 %v1322_v53  ;;  %v5526_v53 = vld [vmem:[#allocation3 + $0x2f0] ss:$12 sps:$4 sm:$0xff]  }
 0x120   :  { %2816 = vmatprep.mubr.bf16.mxu0 %v1329_v56  ;;  %3155 = vmatprep.mubr.bf16.mxu1 %v1329_v56  ;;  %v6016_v56 = vld [vmem:[#allocation8 + $0x140] ss:$8 sps:$4 sm:$0xff]   ;;  %v1207_v0 = vrot.slane %v5526_v53, %v5873_v54  ;;  %v1346_v54 = vpack.c.bf16 %v1100_v5, %v1046_v4  ;;  %v6086_v53 = vld [vmem:[#allocation8 + $0x1f4] ss:$8 sps:$4 sm:$0xff]  }
 0x121   :  { %3707 = vmatpush1.bf16.msra.mxu0 %v5539_v16  ;;  %4829 = vmatpush1.bf16.msra.mxu1 %v6016_v56 }
 0x122   :  { %3708 = vmatprep.subr.bf16.mxu0 %v5544_v25  ;;  %v1209_v7 = vcombine.high %v1200_v63, %v1207_v0  ;;  %4814 = vmatprep.subr.bf16.mxu1 %v6021_v60  ;;  %v1208_v16 = vcombine.low %v1200_v63, %v1207_v0  ;;  %v5589_v25 = vld [vmem:[#allocation8 + $0xe4] ss:$8 sps:$4 sm:$0xff]  }
 0x124   :  { %v1352_v18 = vpack.c.bf16 %v1208_v16, %v1154_v15 }
 0x125   :  { %3709 = vmatpush1.bf16.msra.mxu0 %v5542_v30  ;;  %4830 = vmatpush1.bf16.msra.mxu1 %v6026_v2  ;;  %v5595_v30 = vld [vmem:[#allocation8 + $0xf4] ss:$8 sps:$4 sm:$0xff]  }
 0x126   :  { %3710 = vmatprep.subr.bf16.mxu0 %v5547_v38  ;;  %4815 = vmatprep.subr.bf16.mxu1 %v6031_v26  ;;  %v6052_v38 = vld [vmem:[#allocation8 + $0x190] ss:$8 sps:$4 sm:$0xff]  }
 0x127   :  { %2817 = vmatmul.mubr.bf16.gmra.mrb[12].mxu0 %v1328_v8  ;;  %3156 = vmatmul.mubr.bf16.gmra.mrb[12].mxu1 %v1328_v8  ;;  %v5557_v8 = vld [vmem:[#allocation8 + $0x90] ss:$8 sps:$4 sm:$0xff]  }
 0x128   :  { %2826 = vmatprep.mubr.bf16.mxu0 %v1335_v12  ;;  %3165 = vmatprep.mubr.bf16.mxu1 %v1335_v12  ;;  %v1353_v12 = vpack.c.bf16 %v1209_v7, %v1155_v6 }
 0x129   :  { %3711 = vmatpush1.bf16.msra.mxu0 %v5545_v44  ;;  %4831 = vmatpush1.bf16.msra.mxu1 %v6033_v28  ;;  %v6068_v44 = vld [vmem:[#allocation8 + $0x1c4] ss:$8 sps:$4 sm:$0xff]  }
 0x12a   :  { %3712 = vmatprep.subr.bf16.mxu0 %v5550_v49  ;;  %v6076_v49 = vld [vmem:[#allocation8 + $0x1d0] ss:$8 sps:$4 sm:$0xff]  }
 0x12d   :  { %3713 = vmatpush1.bf16.msra.mxu0 %v5548_v55  ;;  %v6088_v55 = vld [vmem:[#allocation8 + $0x1f0] ss:$8 sps:$4 sm:$0xff]  }
 0x12e   :  { %3714 = vmatprep.subr.bf16.mxu0 %v5553_v59  ;;  %v1546_v59 = vld [vmem:[%s6416_s2] sm:$0xf] }
 0x12f   :  { %2827 = vmatmul.mubr.bf16.gmra.mrb[16].mxu0 %v1334_v32  ;;  %3166 = vmatmul.mubr.bf16.gmra.mrb[16].mxu1 %v1334_v32  ;;  %v6037_v32 = vld [vmem:[#allocation8 + $0x174] ss:$8 sps:$4 sm:$0xff]   ;;  %v6103_v0 = vrot.slane %v1546_v59, %v1558_v58 }
 0x130   :  { %2836 = vmatprep.mubr.bf16.mxu0 %v1341_v34  ;;  %3175 = vmatprep.mubr.bf16.mxu1 %v1341_v34  ;;  %v6039_v34 = vld [vmem:[#allocation8 + $0x170] ss:$8 sps:$4 sm:$0xff]  }
 0x131   :  { %3715 = vmatpush1.bf16.msra.mxu0 %v5551_v1  ;;  %4816 = vmatprep.subr.bf16.mxu1 %v6037_v32 }
 0x132   :  { %3716 = vmatprep.subr.bf16.mxu0 %v5559_v3  ;;  %4832 = vmatpush1.bf16.msra.mxu1 %v6039_v34  ;;  %v6109_v3 = vrot.slane %v1546_v59, %v1562_v62 }
 0x133   :  { %4817 = vmatprep.subr.bf16.mxu1 %v6044_v35 }
 0x135   :  { %3717 = vmatpush1.bf16.msra.mxu0 %v5557_v8 }
 0x136   :  { %3718 = vmatprep.subr.bf16.mxu0 %v5565_v9  ;;  %4833 = vmatpush1.bf16.msra.mxu1 %v6046_v36 }
 0x137   :  { %2837 = vmatmul.mubr.bf16.gmra.mrb[20].mxu0 %v1340_v57  ;;  %3176 = vmatmul.mubr.bf16.gmra.mrb[20].mxu1 %v1340_v57  ;;  %v1550_v57 = vsub.s32 0, %v5870_v48 }
 0x138   :  { %2846 = vmatprep.mubr.bf16.mxu0 %v1347_v61  ;;  %3185 = vmatprep.mubr.bf16.mxu1 %v1347_v61  ;;  %v1554_v61 = vsub.s32 1, %v5870_v48 }
 0x139   :  { %3719 = vmatpush1.bf16.msra.mxu0 %v5563_v13  ;;  %4818 = vmatprep.subr.bf16.mxu1 %v6050_v37  ;;  %v6101_v63 = vrot.slane %v1546_v59, %v1550_v57 }
 0x13a   :  { %3720 = vmatprep.subr.bf16.mxu0 %v5571_v14  ;;  %4834 = vmatpush1.bf16.msra.mxu1 %v6052_v38  ;;  %v6107_v1 = vrot.slane %v1546_v59, %v1554_v61 }
 0x13b   :  { %4819 = vmatprep.subr.bf16.mxu1 %v6056_v39 }
 0x13d   :  { %3721 = vmatpush1.bf16.msra.mxu0 %v5569_v17 }
 0x13e   :  { %3722 = vmatprep.subr.bf16.mxu0 %v5577_v19  ;;  %4835 = vmatpush1.bf16.msra.mxu1 %v6058_v42 }
 0x13f   :  { %2847 = vmatmul.mubr.bf16.gmra.mrb[24].mxu0 %v1346_v54  ;;  %3186 = vmatmul.mubr.bf16.gmra.mrb[24].mxu1 %v1346_v54 }
 0x140   :  { %2856 = vmatprep.mubr.bf16.mxu0 %v1353_v12  ;;  %3195 = vmatprep.mubr.bf16.mxu1 %v1353_v12 }
 0x141   :  { %3723 = vmatpush1.bf16.msra.mxu0 %v5575_v22 }
 0x142   :  { %3724 = vmatprep.subr.bf16.mxu0 %v5583_v23 }
 0x145   :  { %3725 = vmatpush1.bf16.msra.mxu0 %v5581_v24 }
 0x146   :  { %3726 = vmatprep.subr.bf16.mxu0 %v5589_v25 }
 0x147   :  { %2857 = vmatmul.mubr.bf16.gmra.mrb[28].mxu0 %v1352_v18  ;;  %3196 = vmatmul.mubr.bf16.gmra.mrb[28].mxu1 %v1352_v18 }
 0x149   :  { %3727 = vmatpush1.bf16.msra.mxu0 %v5587_v27 }
 0x14a   :  { %3728 = vmatprep.subr.bf16.mxu0 %v5595_v30 }
 0x14d   :  { %3729 = vmatpush1.bf16.msra.mxu0 %v5593_v33 }
 0x14e   :  { %3811 = vmatprep.subr.bf16.mxu0 %v5972_v11  ;;  %v6062_v11 = vld [vmem:[#allocation8 + $0x1b4] ss:$8 sps:$4 sm:$0xff]  }
 0x14f   :  { %4820 = vmatprep.subr.bf16.mxu1 %v6062_v11 }
 0x150   :  { %4836 = vmatpush1.bf16.msra.mxu1 %v6064_v43 }
 0x151   :  { %4821 = vmatprep.subr.bf16.mxu1 %v6068_v44 }
 0x154   :  { %4837 = vmatpush1.bf16.msra.mxu1 %v6070_v46 }
 0x155   :  { %4822 = vmatprep.subr.bf16.mxu1 %v6074_v47 }
 0x158   :  { %4838 = vmatpush1.bf16.msra.mxu1 %v6076_v49 }
 0x159   :  { %4823 = vmatprep.subr.bf16.mxu1 %v6080_v51 }
 0x15c   :  { %4839 = vmatpush1.bf16.msra.mxu1 %v6082_v52 }
 0x15d   :  { %4824 = vmatprep.subr.bf16.mxu1 %v6086_v53 }
 0x160   :  { %4840 = vmatpush1.bf16.msra.mxu1 %v6088_v55 }
 0x1e2   :  { %v2788_v4 = vpop.f32.mrb[0].mxu0  ;;  %v3127_v5 = vpop.f32.mrb[0].mxu1 }
 0x1e3   :  { %v4841_v6 = vadd.f32 %v2788_v4, %v6101_v63  ;;  %v4873_v7 = vadd.f32 %v3127_v5, %v6103_v0  ;;  %v2790_v8 = vpop.f32.mrb[1].mxu0  ;;  %v3129_v54 = vpop.f32.mrb[1].mxu1 }
 0x1e4   :  { %v4842_v9 = vadd.f32 %v2790_v8, %v6107_v1  ;;  %v4874_v12 = vadd.f32 %v3129_v54, %v6109_v3  ;;  %v2792_v13 = vpop.f32.mrb[2].mxu0  ;;  %v3131_v14 = vpop.f32.mrb[2].mxu1 }
 0x1e5   :  { %v4843_v15 = vadd.f32 %v2792_v13, %v6101_v63  ;;  %v4875_v16 = vadd.f32 %v3131_v14, %v6103_v0  ;;  %v2794_v17 = vpop.f32.mrb[3].mxu0  ;;  %v3133_v18 = vpop.f32.mrb[3].mxu1  ;;  %v3206_v23 = vmax.f32 %v4841_v6, 0.0  ;;  %v3208_v24 = vmax.f32 %v4873_v7, 0.0 }
 0x1e6   :  { %v4844_v19 = vadd.f32 %v2794_v17, %v6107_v1  ;;  %v4876_v22 = vadd.f32 %v3133_v18, %v6109_v3  ;;  %v3207_v30 = vmax.f32 %v4842_v9, 0.0  ;;  %v3209_v33 = vmax.f32 %v4874_v12, 0.0 }
 0x1e7   :  { %v3210_v25 = vmax.f32 %v4843_v15, 0.0  ;;  %v3212_v27 = vmax.f32 %v4875_v16, 0.0 }
 0x1e8   :  { %v3211_v58 = vmax.f32 %v4844_v19, 0.0  ;;  %v3213_v59 = vmax.f32 %v4876_v22, 0.0 }
 0x1e9   :  { %v3270_v62 = vpack.c.bf16 %v3210_v25, %v3206_v23  ;;  %v6119_v4 = vpack.c.bf16 %v3212_v27, %v3208_v24 }
 0x1ea   :  { %v3271_v5 = vpack.c.bf16 %v3211_v58, %v3207_v30  ;;  %v6121_v8 = vpack.c.bf16 %v3213_v59, %v3209_v33  ;;  %v2798_v54 = vpop.f32.mrb[4].mxu0  ;;  %v3137_v13 = vpop.f32.mrb[4].mxu1 }
 0x1eb   :  { %v4845_v14 = vadd.f32 %v2798_v54, %v6101_v63  ;;  %v4877_v17 = vadd.f32 %v3137_v13, %v6103_v0  ;;  %v2800_v6 = vpop.f32.mrb[5].mxu0  ;;  %v3139_v7 = vpop.f32.mrb[5].mxu1 }
 0x1ec   :  { %v4846_v15 = vadd.f32 %v2800_v6, %v6107_v1  ;;  %v4878_v9 = vadd.f32 %v3139_v7, %v6109_v3  ;;  %v2802_v12 = vpop.f32.mrb[6].mxu0  ;;  %v3141_v16 = vpop.f32.mrb[6].mxu1  ;;  %3730 = vmatprep.mubr.bf16.mxu0 %v3271_v5 }
 0x1ed   :  { %v4847_v18 = vadd.f32 %v2802_v12, %v6101_v63  ;;  %v4879_v19 = vadd.f32 %v3141_v16, %v6103_v0  ;;  %v2804_v22 = vpop.f32.mrb[7].mxu0  ;;  %v3143_v23 = vpop.f32.mrb[7].mxu1  ;;  %3731 = vmatmul.mubr.bf16.vlgmr.msra.gmra.mrb[32].mxu0 %v3270_v62  ;;  %v3214_v27 = vmax.f32 %v4845_v14, 0.0  ;;  %v3216_v30 = vmax.f32 %v4877_v17, 0.0 }
 0x1ee   :  { %v4848_v24 = vadd.f32 %v2804_v22, %v6107_v1  ;;  %v4880_v25 = vadd.f32 %v3143_v23, %v6109_v3  ;;  %3812 = vmatpush1.bf16.msra.mxu0 %v5970_v10  ;;  %v3215_v59 = vmax.f32 %v4846_v15, 0.0  ;;  %v3217_v5 = vmax.f32 %v4878_v9, 0.0 }
 0x1ef   :  { %v3218_v33 = vmax.f32 %v4847_v18, 0.0  ;;  %v3220_v58 = vmax.f32 %v4879_v19, 0.0  ;;  %3813 = vmatprep.subr.bf16.mxu0 %v5987_v21 }
 0x1f0   :  { %v3219_v54 = vmax.f32 %v4848_v24, 0.0  ;;  %v3221_v13 = vmax.f32 %v4880_v25, 0.0 }
 0x1f1   :  { %v3274_v6 = vpack.c.bf16 %v3218_v33, %v3214_v27  ;;  %v6133_v7 = vpack.c.bf16 %v3220_v58, %v3216_v30 }
 0x1f2   :  { %v3275_v62 = vpack.c.bf16 %v3219_v54, %v3215_v59  ;;  %v6135_v12 = vpack.c.bf16 %v3221_v13, %v3217_v5  ;;  %v2808_v16 = vpop.f32.mrb[8].mxu0  ;;  %v3147_v22 = vpop.f32.mrb[8].mxu1  ;;  %3814 = vmatpush1.bf16.msra.mxu0 %v5985_v20 }
 0x1f3   :  { %v4849_v10 = vadd.f32 %v2808_v16, %v6101_v63  ;;  %v4881_v14 = vadd.f32 %v3147_v22, %v6103_v0  ;;  %v2810_v17 = vpop.f32.mrb[9].mxu0  ;;  %v3149_v21 = vpop.f32.mrb[9].mxu1  ;;  %3815 = vmatprep.subr.bf16.mxu0 %v5994_v29 }
 0x1f4   :  { %v4850_v15 = vadd.f32 %v2810_v17, %v6107_v1  ;;  %v4882_v9 = vadd.f32 %v3149_v21, %v6109_v3  ;;  %v2812_v18 = vpop.f32.mrb[10].mxu0  ;;  %v3151_v19 = vpop.f32.mrb[10].mxu1  ;;  %3740 = vmatprep.mubr.bf16.mxu0 %v3275_v62 }
 0x1f5   :  { %v4851_v23 = vadd.f32 %v2812_v18, %v6101_v63  ;;  %v4883_v24 = vadd.f32 %v3151_v19, %v6103_v0  ;;  %v2814_v20 = vpop.f32.mrb[11].mxu0  ;;  %v3153_v25 = vpop.f32.mrb[11].mxu1  ;;  %3741 = vmatmul.mubr.bf16.gmra.mrb[36].mxu0 %v3274_v6  ;;  %v3222_v29 = vmax.f32 %v4849_v10, 0.0  ;;  %v3224_v33 = vmax.f32 %v4881_v14, 0.0 }
 0x1f6   :  { %v4852_v27 = vadd.f32 %v2814_v20, %v6107_v1  ;;  %v4884_v30 = vadd.f32 %v3153_v25, %v6109_v3  ;;  %3816 = vmatpush1.bf16.msra.mxu0 %v5997_v31  ;;  %v3223_v5 = vmax.f32 %v4850_v15, 0.0  ;;  %v3225_v54 = vmax.f32 %v4882_v9, 0.0 }
 0x1f7   :  { %v3226_v58 = vmax.f32 %v4851_v23, 0.0  ;;  %v3228_v59 = vmax.f32 %v4883_v24, 0.0  ;;  %3817 = vmatprep.subr.bf16.mxu0 %v6004_v40 }
 0x1f8   :  { %v3227_v13 = vmax.f32 %v4852_v27, 0.0  ;;  %v3229_v62 = vmax.f32 %v4884_v30, 0.0 }
 0x1f9   :  { %v3278_v16 = vpack.c.bf16 %v3226_v58, %v3222_v29  ;;  %v6149_v22 = vpack.c.bf16 %v3228_v59, %v3224_v33 }
 0x1fa   :  { %v3279_v6 = vpack.c.bf16 %v3227_v13, %v3223_v5  ;;  %v6151_v17 = vpack.c.bf16 %v3229_v62, %v3225_v54  ;;  %v2818_v21 = vpop.f32.mrb[12].mxu0  ;;  %v3157_v18 = vpop.f32.mrb[12].mxu1  ;;  %3818 = vmatpush1.bf16.msra.mxu0 %v6007_v45 }
 0x1fb   :  { %v4853_v31 = vadd.f32 %v2818_v21, %v6101_v63  ;;  %v4885_v10 = vadd.f32 %v3157_v18, %v6103_v0  ;;  %v2820_v14 = vpop.f32.mrb[13].mxu0  ;;  %v3159_v40 = vpop.f32.mrb[13].mxu1  ;;  %3819 = vmatprep.subr.bf16.mxu0 %v6013_v50 }
 0x1fc   :  { %v4854_v15 = vadd.f32 %v2820_v14, %v6107_v1  ;;  %v4886_v9 = vadd.f32 %v3159_v40, %v6109_v3  ;;  %v2822_v19 = vpop.f32.mrb[14].mxu0  ;;  %v3161_v23 = vpop.f32.mrb[14].mxu1  ;;  %3750 = vmatprep.mubr.bf16.mxu0 %v3279_v6 }
 0x1fd   :  { %v4855_v24 = vadd.f32 %v2822_v19, %v6101_v63  ;;  %v4887_v20 = vadd.f32 %v3161_v23, %v6103_v0  ;;  %v2824_v45 = vpop.f32.mrb[15].mxu0  ;;  %v3163_v25 = vpop.f32.mrb[15].mxu1  ;;  %3751 = vmatmul.mubr.bf16.gmra.mrb[40].mxu0 %v3278_v16  ;;  %v3230_v50 = vmax.f32 %v4853_v31, 0.0  ;;  %v3232_v29 = vmax.f32 %v4885_v10, 0.0 }
 0x1fe   :  { %v4856_v27 = vadd.f32 %v2824_v45, %v6107_v1  ;;  %v4888_v30 = vadd.f32 %v3163_v25, %v6109_v3  ;;  %3820 = vmatpush1.bf16.msra.mxu0 %v6016_v56  ;;  %v3231_v59 = vmax.f32 %v4854_v15, 0.0  ;;  %v3233_v5 = vmax.f32 %v4886_v9, 0.0 }
 0x1ff   :  { %v3234_v33 = vmax.f32 %v4855_v24, 0.0  ;;  %v3236_v58 = vmax.f32 %v4887_v20, 0.0  ;;  %3821 = vmatprep.subr.bf16.mxu0 %v6021_v60 }
 0x200   :  { %v3235_v54 = vmax.f32 %v4856_v27, 0.0  ;;  %v3237_v13 = vmax.f32 %v4888_v30, 0.0 }
 0x201   :  { %v3282_v62 = vpack.c.bf16 %v3234_v33, %v3230_v50  ;;  %v6165_v6 = vpack.c.bf16 %v3236_v58, %v3232_v29 }
 0x202   :  { %v3283_v16 = vpack.c.bf16 %v3235_v54, %v3231_v59  ;;  %v6167_v21 = vpack.c.bf16 %v3237_v13, %v3233_v5  ;;  %v2828_v18 = vpop.f32.mrb[16].mxu0  ;;  %v3167_v14 = vpop.f32.mrb[16].mxu1  ;;  %3822 = vmatpush1.bf16.msra.mxu0 %v6026_v2 }
 0x203   :  { %v4857_v56 = vadd.f32 %v2828_v18, %v6101_v63  ;;  %v4889_v31 = vadd.f32 %v3167_v14, %v6103_v0  ;;  %v2830_v10 = vpop.f32.mrb[17].mxu0  ;;  %v3169_v60 = vpop.f32.mrb[17].mxu1  ;;  %3823 = vmatprep.subr.bf16.mxu0 %v6031_v26 }
 0x204   :  { %v4858_v40 = vadd.f32 %v2830_v10, %v6107_v1  ;;  %v4890_v15 = vadd.f32 %v3169_v60, %v6109_v3  ;;  %v2832_v9 = vpop.f32.mrb[18].mxu0  ;;  %v3171_v19 = vpop.f32.mrb[18].mxu1  ;;  %3760 = vmatprep.mubr.bf16.mxu0 %v3283_v16 }
 0x205   :  { %v4859_v23 = vadd.f32 %v2832_v9, %v6101_v63  ;;  %v4891_v24 = vadd.f32 %v3171_v19, %v6103_v0  ;;  %v2834_v2 = vpop.f32.mrb[19].mxu0  ;;  %v3173_v20 = vpop.f32.mrb[19].mxu1  ;;  %3761 = vmatmul.mubr.bf16.gmra.mrb[44].mxu0 %v3282_v62  ;;  %v3238_v26 = vmax.f32 %v4857_v56, 0.0  ;;  %v3240_v27 = vmax.f32 %v4889_v31, 0.0 }
 0x206   :  { %v4860_v45 = vadd.f32 %v2834_v2, %v6107_v1  ;;  %v4892_v25 = vadd.f32 %v3173_v20, %v6109_v3  ;;  %3824 = vmatpush1.bf16.msra.mxu0 %v6033_v28  ;;  %v3239_v29 = vmax.f32 %v4858_v40, 0.0  ;;  %v3241_v33 = vmax.f32 %v4890_v15, 0.0 }
 0x207   :  { %v3242_v30 = vmax.f32 %v4859_v23, 0.0  ;;  %v3244_v50 = vmax.f32 %v4891_v24, 0.0  ;;  %3825 = vmatprep.subr.bf16.mxu0 %v6037_v32 }
 0x208   :  { %v3243_v58 = vmax.f32 %v4860_v45, 0.0  ;;  %v3245_v59 = vmax.f32 %v4892_v25, 0.0 }
 0x209   :  { %v3286_v5 = vpack.c.bf16 %v3242_v30, %v3238_v26  ;;  %v3288_v54 = vpack.c.bf16 %v3244_v50, %v3240_v27 }
 0x20a   :  { %v3287_v13 = vpack.c.bf16 %v3243_v58, %v3239_v29  ;;  %v3289_v62 = vpack.c.bf16 %v3245_v59, %v3241_v33  ;;  %v2838_v16 = vpop.f32.mrb[20].mxu0  ;;  %v3177_v18 = vpop.f32.mrb[20].mxu1  ;;  %3826 = vmatpush1.bf16.msra.mxu0 %v6039_v34 }
 0x20b   :  { %v4861_v28 = vadd.f32 %v2838_v16, %v6101_v63  ;;  %v4893_v14 = vadd.f32 %v3177_v18, %v6103_v0  ;;  %v2840_v56 = vpop.f32.mrb[21].mxu0  ;;  %v3179_v31 = vpop.f32.mrb[21].mxu1  ;;  %3827 = vmatprep.subr.bf16.mxu0 %v6044_v35 }
 0x20c   :  { %v4862_v32 = vadd.f32 %v2840_v56, %v6107_v1  ;;  %v4894_v10 = vadd.f32 %v3179_v31, %v6109_v3  ;;  %v2842_v60 = vpop.f32.mrb[22].mxu0  ;;  %v3181_v40 = vpop.f32.mrb[22].mxu1  ;;  %3770 = vmatprep.mubr.bf16.mxu0 %v3287_v13  ;;  %3883 = vmatprep.mubr.bf16.mxu1 %v3289_v62 }
 0x20d   :  { %v4863_v15 = vadd.f32 %v2842_v60, %v6101_v63  ;;  %v4895_v34 = vadd.f32 %v3181_v40, %v6103_v0  ;;  %v2844_v9 = vpop.f32.mrb[23].mxu0  ;;  %v3183_v19 = vpop.f32.mrb[23].mxu1  ;;  %3771 = vmatmul.mubr.bf16.gmra.mrb[48].mxu0 %v3286_v5  ;;  %3884 = vmatmul.mubr.bf16.vlgmr.msra.gmra.mrb[32].mxu1 %v3288_v54  ;;  %v3246_v24 = vmax.f32 %v4861_v28, 0.0  ;;  %v3248_v2 = vmax.f32 %v4893_v14, 0.0 }
 0x20e   :  { %v4864_v23 = vadd.f32 %v2844_v9, %v6107_v1  ;;  %v4896_v35 = vadd.f32 %v3183_v19, %v6109_v3  ;;  %3828 = vmatpush1.bf16.msra.mxu0 %v6046_v36  ;;  %v3247_v25 = vmax.f32 %v4862_v32, 0.0  ;;  %v3249_v26 = vmax.f32 %v4894_v10, 0.0 }
 0x20f   :  { %v3250_v20 = vmax.f32 %v4863_v15, 0.0  ;;  %v3252_v45 = vmax.f32 %v4895_v34, 0.0  ;;  %3829 = vmatprep.subr.bf16.mxu0 %v6050_v37 }
 0x210   :  { %v3251_v27 = vmax.f32 %v4864_v23, 0.0  ;;  %v3253_v30 = vmax.f32 %v4896_v35, 0.0 }
 0x211   :  { %v3290_v50 = vpack.c.bf16 %v3250_v20, %v3246_v24  ;;  %v3292_v29 = vpack.c.bf16 %v3252_v45, %v3248_v2 }
 0x212   :  { %v3291_v33 = vpack.c.bf16 %v3251_v27, %v3247_v25  ;;  %v3293_v58 = vpack.c.bf16 %v3253_v30, %v3249_v26  ;;  %v2848_v59 = vpop.f32.mrb[24].mxu0  ;;  %v3187_v5 = vpop.f32.mrb[24].mxu1  ;;  %3830 = vmatpush1.bf16.msra.mxu0 %v6052_v38 }
 0x213   :  { %v4865_v36 = vadd.f32 %v2848_v59, %v6101_v63  ;;  %v4897_v54 = vadd.f32 %v3187_v5, %v6103_v0  ;;  %v2850_v13 = vpop.f32.mrb[25].mxu0  ;;  %v3189_v62 = vpop.f32.mrb[25].mxu1  ;;  %3831 = vmatprep.subr.bf16.mxu0 %v6056_v39 }
 0x214   :  { %v4866_v37 = vadd.f32 %v2850_v13, %v6107_v1  ;;  %v4898_v16 = vadd.f32 %v3189_v62, %v6109_v3  ;;  %v2852_v18 = vpop.f32.mrb[26].mxu0  ;;  %v3191_v28 = vpop.f32.mrb[26].mxu1  ;;  %3780 = vmatprep.mubr.bf16.mxu0 %v3291_v33  ;;  %3893 = vmatprep.mubr.bf16.mxu1 %v3293_v58 }
 0x215   :  { %v4867_v14 = vadd.f32 %v2852_v18, %v6101_v63  ;;  %v4899_v38 = vadd.f32 %v3191_v28, %v6103_v0  ;;  %v2854_v56 = vpop.f32.mrb[27].mxu0  ;;  %v3193_v31 = vpop.f32.mrb[27].mxu1  ;;  %3781 = vmatmul.mubr.bf16.gmra.mrb[52].mxu0 %v3290_v50  ;;  %3894 = vmatmul.mubr.bf16.gmra.mrb[36].mxu1 %v3292_v29  ;;  %v3254_v10 = vmax.f32 %v4865_v36, 0.0  ;;  %v3256_v60 = vmax.f32 %v4897_v54, 0.0 }
 0x216   :  { %v4868_v32 = vadd.f32 %v2854_v56, %v6107_v1  ;;  %v4900_v39 = vadd.f32 %v3193_v31, %v6109_v3  ;;  %3832 = vmatpush1.bf16.msra.mxu0 %v6058_v42  ;;  %v3255_v34 = vmax.f32 %v4866_v37, 0.0  ;;  %v3257_v9 = vmax.f32 %v4898_v16, 0.0 }
 0x217   :  { %v3258_v40 = vmax.f32 %v4867_v14, 0.0  ;;  %v3260_v15 = vmax.f32 %v4899_v38, 0.0  ;;  %3833 = vmatprep.subr.bf16.mxu0 %v6062_v11 }
 0x218   :  { %v3259_v19 = vmax.f32 %v4868_v32, 0.0  ;;  %v3261_v23 = vmax.f32 %v4900_v39, 0.0 }
 0x219   :  { %v3294_v35 = vpack.c.bf16 %v3258_v40, %v3254_v10  ;;  %v3296_v24 = vpack.c.bf16 %v3260_v15, %v3256_v60 }
 0x21a   :  { %v3295_v2 = vpack.c.bf16 %v3259_v19, %v3255_v34  ;;  %v3297_v20 = vpack.c.bf16 %v3261_v23, %v3257_v9  ;;  %v2858_v45 = vpop.f32.mrb[28].mxu0  ;;  %v3197_v25 = vpop.f32.mrb[28].mxu1  ;;  %3834 = vmatpush1.bf16.msra.mxu0 %v6064_v43 }
 0x21b   :  { %v4869_v42 = vadd.f32 %v2858_v45, %v6101_v63  ;;  %v4901_v26 = vadd.f32 %v3197_v25, %v6103_v0  ;;  %v2860_v27 = vpop.f32.mrb[29].mxu0  ;;  %v3199_v30 = vpop.f32.mrb[29].mxu1  ;;  %3835 = vmatprep.subr.bf16.mxu0 %v6068_v44 }
 0x21c   :  { %v4870_v11 = vadd.f32 %v2860_v27, %v6107_v1  ;;  %v4902_v50 = vadd.f32 %v3199_v30, %v6109_v3  ;;  %v2862_v29 = vpop.f32.mrb[30].mxu0  ;;  %v3201_v33 = vpop.f32.mrb[30].mxu1  ;;  %3790 = vmatprep.mubr.bf16.mxu0 %v3295_v2  ;;  %3903 = vmatprep.mubr.bf16.mxu1 %v3297_v20 }
 0x21d   :  { %v4871_v58 = vadd.f32 %v2862_v29, %v6101_v63  ;;  %v4903_v43 = vadd.f32 %v3201_v33, %v6103_v0  ;;  %v2864_v59 = vpop.f32.mrb[31].mxu0  ;;  %v3203_v5 = vpop.f32.mrb[31].mxu1  ;;  %3791 = vmatmul.mubr.bf16.gmra.mrb[56].mxu0 %v3294_v35  ;;  %3904 = vmatmul.mubr.bf16.gmra.mrb[40].mxu1 %v3296_v24  ;;  %v3262_v54 = vmax.f32 %v4869_v42, 0.0  ;;  %v3264_v13 = vmax.f32 %v4901_v26, 0.0 }
 0x21e   :  { %v4872_v36 = vadd.f32 %v2864_v59, %v6107_v1  ;;  %v4904_v44 = vadd.f32 %v3203_v5, %v6109_v3  ;;  %3836 = vmatpush1.bf16.msra.mxu0 %v6070_v46  ;;  %v3263_v16 = vmax.f32 %v4870_v11, 0.0  ;;  %v3265_v63 = vmax.f32 %v4902_v50, 0.0  ;;  %v5623_v46 = vld [vmem:[#allocation9 + $0x40] sm:$0xff]   ;;  %v5630_v1 = vld [vmem:[#allocation9 + $0x18] sm:$0xff]  }
 0x21f   :  { %v3266_v62 = vmax.f32 %v4871_v58, 0.0  ;;  %v3268_v37 = vmax.f32 %v4903_v43, 0.0  ;;  %3837 = vmatprep.subr.bf16.mxu0 %v6074_v47  ;;  %v5624_v47 = vld [vmem:[#allocation9] sm:$0xff]   ;;  %4745 = vmatprep.subr.bf16.mxu1 %v5623_v46 }
 0x220   :  { %v3267_v18 = vmax.f32 %v4872_v36, 0.0  ;;  %v3269_v0 = vmax.f32 %v4904_v44, 0.0  ;;  %4746 = vmatpush3.bf16.msra.mxu1 %v5624_v47  ;;  %v5631_v3 = vld [vmem:[#allocation9 + $0x60] sm:$0xff]  }
 0x221   :  { %v3298_v28 = vpack.c.bf16 %v3266_v62, %v3262_v54  ;;  %v3300_v14 = vpack.c.bf16 %v3268_v37, %v3264_v13 }
 0x222   :  { %v3299_v38 = vpack.c.bf16 %v3267_v18, %v3263_v16  ;;  %v3301_v56 = vpack.c.bf16 %v3269_v0, %v3265_v63  ;;  %3838 = vmatpush1.bf16.msra.mxu0 %v6076_v49  ;;  %v5625_v49 = vld [vmem:[#allocation9 + $0x48] sm:$0xff]  }
 0x223   :  { %3839 = vmatprep.subr.bf16.mxu0 %v6080_v51  ;;  %v5626_v51 = vld [vmem:[#allocation9 + $0x8] sm:$0xff]   ;;  %4747 = vmatprep.subr.bf16.mxu1 %v5625_v49 }
 0x224   :  { %3800 = vmatprep.mubr.bf16.mxu0 %v3299_v38  ;;  %3913 = vmatprep.mubr.bf16.mxu1 %v3301_v56 }
 0x225   :  { %3801 = vmatmul.mubr.bf16.gmra.mrb[60].mxu0 %v3298_v28  ;;  %3914 = vmatmul.mubr.bf16.gmra.mrb[44].mxu1 %v3300_v14 }
 0x226   :  { %3840 = vmatpush1.bf16.msra.mxu0 %v6082_v52  ;;  %3843 = vmatprep.mubr.bf16.mxu0 %v6121_v8  ;;  %v5627_v52 = vld [vmem:[#allocation9 + $0x50] sm:$0xff]   ;;  %v5633_v8 = vld [vmem:[#allocation9 + $0x68] sm:$0xff]  }
 0x227   :  { %3841 = vmatprep.subr.bf16.mxu0 %v6086_v53  ;;  %4748 = vmatpush3.bf16.msra.mxu1 %v5626_v51  ;;  %v5628_v53 = vld [vmem:[#allocation9 + $0x10] sm:$0xff]  }
 0x228   :  { %4749 = vmatprep.subr.bf16.mxu1 %v5627_v52 }
 0x22a   :  { %3842 = vmatpush1.bf16.msra.mxu0 %v6088_v55  ;;  %v5629_v55 = vld [vmem:[#allocation9 + $0x58] sm:$0xff]  }
 0x22b   :  { %4750 = vmatpush3.bf16.msra.mxu1 %v5628_v53 }
 0x22c   :  { %4751 = vmatprep.subr.bf16.mxu1 %v5629_v55 }
 0x22d   :  { %3844 = vmatmul.mubr.bf16.vlgmr.msra.gmra.mrb[32].mxu0 %v6119_v4  ;;  %v5632_v4 = vld [vmem:[#allocation9 + $0x20] sm:$0xff]  }
 0x22e   :  { %3853 = vmatprep.mubr.bf16.mxu0 %v6135_v12  ;;  %v5635_v12 = vld [vmem:[#allocation9 + $0x70] sm:$0xff]  }
 0x22f   :  { %4752 = vmatpush3.bf16.msra.mxu1 %v5630_v1 }
 0x230   :  { %4753 = vmatprep.subr.bf16.mxu1 %v5631_v3 }
 0x233   :  { %4754 = vmatpush3.bf16.msra.mxu1 %v5632_v4 }
 0x234   :  { %4755 = vmatprep.subr.bf16.mxu1 %v5633_v8 }
 0x235   :  { %3854 = vmatmul.mubr.bf16.gmra.mrb[36].mxu0 %v6133_v7  ;;  %v5634_v7 = vld [vmem:[#allocation9 + $0x28] sm:$0xff]  }
 0x236   :  { %3863 = vmatprep.mubr.bf16.mxu0 %v6151_v17  ;;  %v5637_v17 = vld [vmem:[#allocation9 + $0x78] sm:$0xff]  }
 0x237   :  { %4756 = vmatpush3.bf16.msra.mxu1 %v5634_v7 }
 0x238   :  { %4757 = vmatprep.subr.bf16.mxu1 %v5635_v12 }
 0x23d   :  { %3864 = vmatmul.mubr.bf16.gmra.mrb[40].mxu0 %v6149_v22  ;;  %v5636_v22 = vld [vmem:[#allocation9 + $0x30] sm:$0xff]  }
 0x23e   :  { %3873 = vmatprep.mubr.bf16.mxu0 %v6167_v21  ;;  %4758 = vmatpush3.bf16.msra.mxu1 %v5636_v22  ;;  %v3366_v21 = vld [vmem:[%s6418_s4] sm:$0x3] }
 0x23f   :  { %4759 = vmatprep.subr.bf16.mxu1 %v5637_v17  ;;  %v6235_v31 = vrot.slane %v3366_v21, %v1550_v57  ;;  %v6239_v32 = vrot.slane %v3366_v21, %v1554_v61 }
 0x245   :  { %3874 = vmatmul.mubr.bf16.gmra.mrb[44].mxu0 %v6165_v6  ;;  %v5638_v6 = vld [vmem:[#allocation9 + $0x38] sm:$0xff]  }
 0x246   :  { %4760 = vmatpush3.bf16.msra.mxu1 %v5638_v6 }
 0x2e0   :  { %v3772_v39 = vpop.f32.mrb[48].mxu0  ;;  %v3885_v10 = vpop.f32.mrb[32].mxu1 }
 0x2e1   :  { %v3773_v60 = vadd.f32 %v3772_v39, %v6235_v31  ;;  %v3774_v40 = vpop.f32.mrb[49].mxu0  ;;  %v3887_v15 = vpop.f32.mrb[33].mxu1 }
 0x2e2   :  { %v3775_v34 = vadd.f32 %v3774_v40, %v6239_v32  ;;  %v3776_v9 = vpop.f32.mrb[50].mxu0  ;;  %v3889_v19 = vpop.f32.mrb[34].mxu1 }
 0x2e3   :  { %v3886_v23 = vadd.f32 %v3885_v10, %v3773_v60  ;;  %v3777_v35 = vadd.f32 %v3776_v9, %v6235_v31  ;;  %v3778_v24 = vpop.f32.mrb[51].mxu0  ;;  %v3891_v57 = vpop.f32.mrb[35].mxu1 }
 0x2e4   :  { %v3888_v2 = vadd.f32 %v3887_v15, %v3775_v34  ;;  %v3779_v20 = vadd.f32 %v3778_v24, %v6239_v32 }
 0x2e5   :  { %v3890_v61 = vadd.f32 %v3889_v19, %v3777_v35  ;;  %v3940_v25 = vmax.f32 %v3886_v23, 0.0 }
 0x2e6   :  { %v3892_v45 = vadd.f32 %v3891_v57, %v3779_v20  ;;  %v3941_v26 = vmax.f32 %v3888_v2, 0.0 }
 0x2e7   :  { %v3942_v42 = vmax.f32 %v3890_v61, 0.0 }
 0x2e8   :  { %v3943_v27 = vmax.f32 %v3892_v45, 0.0  ;;  %v3782_v30 = vpop.f32.mrb[52].mxu0  ;;  %v3895_v11 = vpop.f32.mrb[36].mxu1 }
 0x2e9   :  { %v6245_v50 = vpack.c.bf16 %v3942_v42, %v3940_v25  ;;  %v3783_v29 = vadd.f32 %v3782_v30, %v6235_v31  ;;  %v3784_v33 = vpop.f32.mrb[53].mxu0  ;;  %v3897_v58 = vpop.f32.mrb[37].mxu1 }
 0x2ea   :  { %v6248_v43 = vpack.c.bf16 %v3943_v27, %v3941_v26  ;;  %v3785_v59 = vadd.f32 %v3784_v33, %v6239_v32  ;;  %v3786_v5 = vpop.f32.mrb[54].mxu0  ;;  %v3899_v36 = vpop.f32.mrb[38].mxu1 }
 0x2eb   :  { %v3896_v44 = vadd.f32 %v3895_v11, %v3783_v29  ;;  %v3787_v54 = vadd.f32 %v3786_v5, %v6235_v31  ;;  %v3788_v13 = vpop.f32.mrb[55].mxu0  ;;  %v3901_v62 = vpop.f32.mrb[39].mxu1 }
 0x2ec   :  { %v3898_v37 = vadd.f32 %v3897_v58, %v3785_v59  ;;  %v3789_v16 = vadd.f32 %v3788_v13, %v6239_v32 }
 0x2ed   :  { %v3900_v63 = vadd.f32 %v3899_v36, %v3787_v54  ;;  %v3944_v0 = vmax.f32 %v3896_v44, 0.0 }
 0x2ee   :  { %v3902_v18 = vadd.f32 %v3901_v62, %v3789_v16  ;;  %v3945_v14 = vmax.f32 %v3898_v37, 0.0 }
 0x2ef   :  { %v3946_v28 = vmax.f32 %v3900_v63, 0.0 }
 0x2f0   :  { %v3947_v38 = vmax.f32 %v3902_v18, 0.0  ;;  %v3792_v56 = vpop.f32.mrb[56].mxu0  ;;  %v3905_v46 = vpop.f32.mrb[40].mxu1 }
 0x2f1   :  { %v6253_v47 = vpack.c.bf16 %v3946_v28, %v3944_v0  ;;  %v3793_v49 = vadd.f32 %v3792_v56, %v6235_v31  ;;  %v3794_v51 = vpop.f32.mrb[57].mxu0  ;;  %v3907_v52 = vpop.f32.mrb[41].mxu1 }
 0x2f2   :  { %v6256_v53 = vpack.c.bf16 %v3947_v38, %v3945_v14  ;;  %v3795_v55 = vadd.f32 %v3794_v51, %v6239_v32  ;;  %v3796_v1 = vpop.f32.mrb[58].mxu0  ;;  %v3909_v3 = vpop.f32.mrb[42].mxu1 }
 0x2f3   :  { %v3906_v4 = vadd.f32 %v3905_v46, %v3793_v49  ;;  %v3797_v8 = vadd.f32 %v3796_v1, %v6235_v31  ;;  %v3798_v7 = vpop.f32.mrb[59].mxu0  ;;  %v3911_v12 = vpop.f32.mrb[43].mxu1 }
 0x2f4   :  { %v3908_v22 = vadd.f32 %v3907_v52, %v3795_v55  ;;  %v3799_v17 = vadd.f32 %v3798_v7, %v6239_v32 }
 0x2f5   :  { %v3910_v6 = vadd.f32 %v3909_v3, %v3797_v8  ;;  %v3948_v39 = vmax.f32 %v3906_v4, 0.0 }
 0x2f6   :  { %v3912_v21 = vadd.f32 %v3911_v12, %v3799_v17  ;;  %v3949_v60 = vmax.f32 %v3908_v22, 0.0 }
 0x2f7   :  { %v3950_v10 = vmax.f32 %v3910_v6, 0.0 }
 0x2f8   :  { %v3951_v40 = vmax.f32 %v3912_v21, 0.0  ;;  %v3802_v15 = vpop.f32.mrb[60].mxu0  ;;  %v3915_v34 = vpop.f32.mrb[44].mxu1 }
 0x2f9   :  { %v6261_v9 = vpack.c.bf16 %v3950_v10, %v3948_v39  ;;  %v3803_v19 = vadd.f32 %v3802_v15, %v6235_v31  ;;  %v3804_v23 = vpop.f32.mrb[61].mxu0  ;;  %v3917_v35 = vpop.f32.mrb[45].mxu1 }
 0x2fa   :  { %v6264_v24 = vpack.c.bf16 %v3951_v40, %v3949_v60  ;;  %v3805_v57 = vadd.f32 %v3804_v23, %v6239_v32  ;;  %v3806_v2 = vpop.f32.mrb[62].mxu0  ;;  %v3919_v20 = vpop.f32.mrb[46].mxu1 }
 0x2fb   :  { %v3916_v61 = vadd.f32 %v3915_v34, %v3803_v19  ;;  %v3807_v45 = vadd.f32 %v3806_v2, %v6235_v31  ;;  %v3808_v25 = vpop.f32.mrb[63].mxu0  ;;  %v3921_v42 = vpop.f32.mrb[47].mxu1 }
 0x2fc   :  { %v3918_v26 = vadd.f32 %v3917_v35, %v3805_v57  ;;  %v3809_v27 = vadd.f32 %v3808_v25, %v6239_v32 }
 0x2fd   :  { %v3920_v30 = vadd.f32 %v3919_v20, %v3807_v45  ;;  %v3952_v29 = vmax.f32 %v3916_v61, 0.0 }
 0x2fe   :  { %v3922_v11 = vadd.f32 %v3921_v42, %v3809_v27  ;;  %v3953_v58 = vmax.f32 %v3918_v26, 0.0 }
 0x2ff   :  { %v3954_v33 = vmax.f32 %v3920_v30, 0.0 }
 0x300   :  { %v3955_v59 = vmax.f32 %v3922_v11, 0.0  ;;  %v3845_v5 = vpop.f32.mrb[32].mxu0 }
 0x301   :  { %v6269_v36 = vpack.c.bf16 %v3954_v33, %v3952_v29  ;;  %v4905_v44 = vadd.f32 %v3845_v5, %v6235_v31  ;;  %v3847_v54 = vpop.f32.mrb[33].mxu0 }
 0x302   :  { %v6272_v13 = vpack.c.bf16 %v3955_v59, %v3953_v58  ;;  %v4906_v62 = vadd.f32 %v3847_v54, %v6239_v32  ;;  %v3849_v37 = vpop.f32.mrb[34].mxu0 }
 0x303   :  { %v4907_v16 = vadd.f32 %v3849_v37, %v6235_v31  ;;  %v3851_v63 = vpop.f32.mrb[35].mxu0  ;;  %v3924_v0 = vmax.f32 %v4905_v44, 0.0 }
 0x304   :  { %v4908_v18 = vadd.f32 %v3851_v63, %v6239_v32  ;;  %v3925_v14 = vmax.f32 %v4906_v62, 0.0 }
 0x305   :  { %v3926_v28 = vmax.f32 %v4907_v16, 0.0 }
 0x306   :  { %v3927_v38 = vmax.f32 %v4908_v18, 0.0 }
 0x307   :  { %v3956_v56 = vpack.c.bf16 %v3926_v28, %v3924_v0 }
 0x308   :  { %v3957_v46 = vpack.c.bf16 %v3927_v38, %v3925_v14  ;;  %v3855_v49 = vpop.f32.mrb[36].mxu0 }
 0x309   :  { %v4909_v51 = vadd.f32 %v3855_v49, %v6235_v31  ;;  %v3857_v52 = vpop.f32.mrb[37].mxu0 }
 0x30a   :  { %v4910_v55 = vadd.f32 %v3857_v52, %v6239_v32  ;;  %v3859_v1 = vpop.f32.mrb[38].mxu0  ;;  %4139 = vmatprep.mubr.bf16.mxu1 %v3957_v46 }
 0x30b   :  { %v4911_v3 = vadd.f32 %v3859_v1, %v6235_v31  ;;  %v3861_v4 = vpop.f32.mrb[39].mxu0  ;;  %4140 = vmatmul.mubr.bf16.vlgmr.msra.gmra.mrb[48].mxu1 %v3956_v56  ;;  %v3928_v7 = vmax.f32 %v4909_v51, 0.0 }
 0x30c   :  { %v4912_v8 = vadd.f32 %v3861_v4, %v6239_v32  ;;  %v3929_v22 = vmax.f32 %v4910_v55, 0.0 }
 0x30d   :  { %v3930_v12 = vmax.f32 %v4911_v3, 0.0 }
 0x30e   :  { %v3931_v17 = vmax.f32 %v4912_v8, 0.0 }
 0x30f   :  { %v3958_v6 = vpack.c.bf16 %v3930_v12, %v3928_v7 }
 0x310   :  { %v3959_v21 = vpack.c.bf16 %v3931_v17, %v3929_v22  ;;  %v3865_v39 = vpop.f32.mrb[40].mxu0 }
 0x311   :  { %v4913_v10 = vadd.f32 %v3865_v39, %v6235_v31  ;;  %v3867_v60 = vpop.f32.mrb[41].mxu0 }
 0x312   :  { %v4914_v40 = vadd.f32 %v3867_v60, %v6239_v32  ;;  %v3869_v15 = vpop.f32.mrb[42].mxu0  ;;  %4147 = vmatprep.mubr.bf16.mxu1 %v3959_v21 }
 0x313   :  { %v4915_v34 = vadd.f32 %v3869_v15, %v6235_v31  ;;  %v3871_v19 = vpop.f32.mrb[43].mxu0  ;;  %4148 = vmatmul.mubr.bf16.gmra.mrb[52].mxu1 %v3958_v6  ;;  %v3932_v35 = vmax.f32 %v4913_v10, 0.0 }
 0x314   :  { %v4916_v23 = vadd.f32 %v3871_v19, %v6239_v32  ;;  %v3933_v2 = vmax.f32 %v4914_v40, 0.0 }
 0x315   :  { %v3934_v57 = vmax.f32 %v4915_v34, 0.0 }
 0x316   :  { %v3935_v20 = vmax.f32 %v4916_v23, 0.0 }
 0x317   :  { %v3960_v61 = vpack.c.bf16 %v3934_v57, %v3932_v35 }
 0x318   :  { %v3961_v45 = vpack.c.bf16 %v3935_v20, %v3933_v2  ;;  %v3875_v25 = vpop.f32.mrb[44].mxu0 }
 0x319   :  { %v4917_v42 = vadd.f32 %v3875_v25, %v6235_v31  ;;  %v3877_v26 = vpop.f32.mrb[45].mxu0 }
 0x31a   :  { %v4918_v27 = vadd.f32 %v3877_v26, %v6239_v32  ;;  %v3879_v30 = vpop.f32.mrb[46].mxu0  ;;  %4155 = vmatprep.mubr.bf16.mxu1 %v3961_v45 }
 0x31b   :  { %v4919_v11 = vadd.f32 %v3879_v30, %v6235_v31  ;;  %v3881_v29 = vpop.f32.mrb[47].mxu0  ;;  %4156 = vmatmul.mubr.bf16.gmra.mrb[56].mxu1 %v3960_v61  ;;  %v3936_v58 = vmax.f32 %v4917_v42, 0.0 }
 0x31c   :  { %v4920_v33 = vadd.f32 %v3881_v29, %v6239_v32  ;;  %v3937_v5 = vmax.f32 %v4918_v27, 0.0 }
 0x31d   :  { %v3938_v59 = vmax.f32 %v4919_v11, 0.0 }
 0x31e   :  { %v3939_v44 = vmax.f32 %v4920_v33, 0.0 }
 0x31f   :  { %v3962_v54 = vpack.c.bf16 %v3938_v59, %v3936_v58 }
 0x320   :  { %v3963_v62 = vpack.c.bf16 %v3939_v44, %v3937_v5 }
 0x322   :  { %4163 = vmatprep.mubr.bf16.mxu1 %v3963_v62 }
 0x323   :  { %4164 = vmatmul.mubr.bf16.gmra.mrb[60].mxu1 %v3962_v54 }
 0x324   :  { %4171 = vmatprep.mubr.bf16.mxu1 %v6248_v43  ;;  %v6300_v43 = vld [vmem:[%s6420_s6] ss:$0 sm:$0xff] }
 0x32b   :  { %4172 = vmatmul.mubr.bf16.gmra.mrb[64].mxu1 %v6245_v50 }
 0x32c   :  { %4179 = vmatprep.mubr.bf16.mxu1 %v6256_v53 }
 0x333   :  { %4180 = vmatmul.mubr.bf16.gmra.mrb[68].mxu1 %v6253_v47 }
 0x334   :  { %4187 = vmatprep.mubr.bf16.mxu1 %v6264_v24 }
 0x33b   :  { %4188 = vmatmul.mubr.bf16.gmra.mrb[72].mxu1 %v6261_v9  ;;  %v6306_v9 = vld [vmem:[%s6421_s7] ss:$0 sm:$0xff] }
 0x33c   :  { %4195 = vmatprep.mubr.bf16.mxu1 %v6272_v13 }
 0x343   :  { %4196 = vmatmul.mubr.bf16.gmra.mrb[76].mxu1 %v6269_v36 }
 0x3de   :  { %v4761_v31 = vpop.f32.mrb[48].mxu1 }
 0x3df   :  { %v4762_v32 = vpop.f32.mrb[49].mxu1 }
 0x3e0   :  { %v4763_v50 = vadd.f32 %v4762_v32, %v4761_v31  ;;  %v4764_v37 = vpop.f32.mrb[50].mxu1 }
 0x3e1   :  { %v4765_v53 = vpop.f32.mrb[51].mxu1 }
 0x3e2   :  { %v4766_v16 = vadd.f32 %v4765_v53, %v4764_v37  ;;  %v4142_v47 = vadd.f32 %v4763_v50, %v6300_v43 }
 0x3e4   :  { %v4145_v24 = vadd.f32 %v4766_v16, %v6300_v43  ;;  %v4204_v36 = vmax.f32 %v4142_v47, 0.0 }
 0x3e6   :  { %v4205_v13 = vmax.f32 %v4145_v24, 0.0  ;;  %v4767_v63 = vpop.f32.mrb[52].mxu1  ;;  %v4227_v18 = vmul.f32 %v6306_v9, %v4204_v36 }
 0x3e7   :  { %v4768_v0 = vpop.f32.mrb[53].mxu1 }
 0x3e8   :  { %v4769_v28 = vadd.f32 %v4768_v0, %v4767_v63  ;;  %v4770_v14 = vpop.f32.mrb[54].mxu1  ;;  %4243 = vadd.xlane.f32.xlu0 %v4227_v18  ;;  %v4228_v46 = vmul.f32 %v6306_v9, %v4205_v13 }
 0x3e9   :  { %v4771_v38 = vpop.f32.mrb[55].mxu1 }
 0x3ea   :  { %v4772_v56 = vadd.f32 %v4771_v38, %v4770_v14  ;;  %v4150_v49 = vadd.f32 %v4769_v28, %v6300_v43 }
 0x3ec   :  { %v4153_v51 = vadd.f32 %v4772_v56, %v6300_v43  ;;  %4245 = vadd.xlane.f32.xlu0 %v4228_v46  ;;  %v4206_v52 = vmax.f32 %v4150_v49, 0.0 }
 0x3ee   :  { %v4207_v55 = vmax.f32 %v4153_v51, 0.0  ;;  %v4773_v1 = vpop.f32.mrb[56].mxu1  ;;  %v4229_v3 = vmul.f32 %v6306_v9, %v4206_v52 }
 0x3ef   :  { %v4774_v4 = vpop.f32.mrb[57].mxu1 }
 0x3f0   :  { %v4775_v8 = vadd.f32 %v4774_v4, %v4773_v1  ;;  %v4776_v7 = vpop.f32.mrb[58].mxu1  ;;  %4247 = vadd.xlane.f32.xlu1 %v4229_v3  ;;  %v4230_v6 = vmul.f32 %v6306_v9, %v4207_v55 }
 0x3f1   :  { %v4777_v12 = vpop.f32.mrb[59].mxu1 }
 0x3f2   :  { %v4158_v22 = vadd.f32 %v4775_v8, %v6300_v43  ;;  %v4778_v17 = vadd.f32 %v4777_v12, %v4776_v7 }
 0x3f4   :  { %v4208_v21 = vmax.f32 %v4158_v22, 0.0  ;;  %v4161_v39 = vadd.f32 %v4778_v17, %v6300_v43  ;;  %4249 = vadd.xlane.f32.xlu1 %v4230_v6 }
 0x3f6   :  { %v4209_v10 = vmax.f32 %v4161_v39, 0.0  ;;  %v4779_v60 = vpop.f32.mrb[60].mxu1  ;;  %v4231_v40 = vmul.f32 %v6306_v9, %v4208_v21 }
 0x3f7   :  { %v4780_v15 = vpop.f32.mrb[61].mxu1 }
 0x3f8   :  { %v4781_v34 = vadd.f32 %v4780_v15, %v4779_v60  ;;  %v4782_v19 = vpop.f32.mrb[62].mxu1  ;;  %4251 = vadd.xlane.f32.xlu0 %v4231_v40  ;;  %v4232_v23 = vmul.f32 %v6306_v9, %v4209_v10 }
 0x3f9   :  { %v4783_v35 = vpop.f32.mrb[63].mxu1 }
 0x3fa   :  { %v4166_v57 = vadd.f32 %v4781_v34, %v6300_v43  ;;  %v4784_v2 = vadd.f32 %v4783_v35, %v4782_v19  ;;  %4253 = vadd.xlane.f32.xlu1 %v4232_v23  ;;  %v6342_v23 = vstv %s6422_s8  ;;  %s5770_s8 = smov [#allocation11]  }
 0x3fb   :  { %s4460_s26 = sshll.u32 %s5770_s8, 4  ;;  %s4461_s26 = int_to_ptr.vmem [resolvable:$true] %s4460_s26 }
 0x3fc   :  { %v4210_v20 = vmax.f32 %v4166_v57, 0.0  ;;  %v4169_v61 = vadd.f32 %v4784_v2, %v6300_v43  ;;  %s5727_s0 = scalar_lea.vmem %s4461_s26, 16  ;;  %s5731_s24 = scalar_lea.vmem %s4461_s26, 32 }
 0x3fd   :  { %p5728_p4 = scmp.ne.s32.totalorder %s4461_s26, %s5727_s0  ;;  %p5732_p5 = scmp.lt.s32.totalorder %s4461_s26, %s4461_s26 }
 0x3fe   :  { %v4211_v45 = vmax.f32 %v4169_v61, 0.0  ;;  %v4785_v25 = vpop.f32.mrb[64].mxu1  ;;  %v4233_v42 = vmul.f32 %v6306_v9, %v4210_v20  ;;  %p5733_p6 = scmp.lt.s32.totalorder %s5731_s24, %s5727_s0 }
 0x3ff   :  { %v4786_v26 = vpop.f32.mrb[65].mxu1 }
 0x400   :  { %v4787_v27 = vadd.f32 %v4786_v26, %v4785_v25  ;;  %4255 = vadd.xlane.f32.xlu0 %v4233_v42  ;;  %v4788_v30 = vpop.f32.mrb[66].mxu1  ;;  %v4234_v11 = vmul.f32 %v6306_v9, %v4211_v45  ;;  %p5734_p7 = por %p5733_p6, %p5732_p5 }
 0x401   :  { %v4789_v29 = vpop.f32.mrb[67].mxu1 }
 0x402   :  { %v4174_v33 = vadd.f32 %v4787_v27, %v6300_v43  ;;  %v4790_v58 = vadd.f32 %v4789_v29, %v4788_v30  ;;  %4257 = vadd.xlane.f32.xlu1 %v4234_v11  ;;  %p5735_p8 = pnand %p5734_p7, %p5728_p4 }
 0x404   :  { %v4212_v59 = vmax.f32 %v4174_v33, 0.0  ;;  %v4177_v5 = vadd.f32 %v4790_v58, %v6300_v43 }
 0x406   :  { %v4213_v44 = vmax.f32 %v4177_v5, 0.0  ;;  %v4791_v54 = vpop.f32.mrb[68].mxu1  ;;  %v4235_v62 = vmul.f32 %v6306_v9, %v4212_v59 }
 0x407   :  { %v4792_v31 = vpop.f32.mrb[69].mxu1 }
 0x408   :  { %v4793_v32 = vadd.f32 %v4792_v31, %v4791_v54  ;;  %v4794_v50 = vpop.f32.mrb[70].mxu1  ;;  %4259 = vadd.xlane.f32.xlu0 %v4235_v62  ;;  %v4236_v37 = vmul.f32 %v6306_v9, %v4213_v44 }
 0x409   :  { %v4795_v53 = vpop.f32.mrb[71].mxu1 }
 0x40a   :  { %v4182_v16 = vadd.f32 %v4793_v32, %v6300_v43  ;;  %v4796_v47 = vadd.f32 %v4795_v53, %v4794_v50  ;;  %4261 = vadd.xlane.f32.xlu1 %v4236_v37 }
 0x40c   :  { %v4214_v24 = vmax.f32 %v4182_v16, 0.0  ;;  %v4185_v36 = vadd.f32 %v4796_v47, %v6300_v43 }
 0x40e   :  { %v4215_v13 = vmax.f32 %v4185_v36, 0.0  ;;  %v4797_v63 = vpop.f32.mrb[72].mxu1  ;;  %v4237_v18 = vmul.f32 %v6306_v9, %v4214_v24 }
 0x40f   :  { %v4798_v0 = vpop.f32.mrb[73].mxu1 }
 0x410   :  { %v4799_v28 = vadd.f32 %v4798_v0, %v4797_v63  ;;  %v4800_v14 = vpop.f32.mrb[74].mxu1  ;;  %4263 = vadd.xlane.f32.xlu0 %v4237_v18  ;;  %v4238_v38 = vmul.f32 %v6306_v9, %v4215_v13 }
 0x411   :  { %v4801_v56 = vpop.f32.mrb[75].mxu1 }
 0x412   :  { %v4190_v46 = vadd.f32 %v4799_v28, %v6300_v43  ;;  %v4802_v49 = vadd.f32 %v4801_v56, %v4800_v14  ;;  %4265 = vadd.xlane.f32.xlu1 %v4238_v38 }
 0x414   :  { %v4216_v51 = vmax.f32 %v4190_v46, 0.0  ;;  %v4193_v52 = vadd.f32 %v4802_v49, %v6300_v43 }
 0x416   :  { %v4217_v55 = vmax.f32 %v4193_v52, 0.0  ;;  %v4803_v1 = vpop.f32.mrb[76].mxu1  ;;  %v4239_v3 = vmul.f32 %v6306_v9, %v4216_v51 }
 0x417   :  { %v4804_v4 = vpop.f32.mrb[77].mxu1 }
 0x418   :  { %v4805_v8 = vadd.f32 %v4804_v4, %v4803_v1  ;;  %v4806_v7 = vpop.f32.mrb[78].mxu1  ;;  %4267 = vadd.xlane.f32.xlu0 %v4239_v3  ;;  %v4240_v12 = vmul.f32 %v6306_v9, %v4217_v55 }
 0x419   :  { %v4807_v22 = vpop.f32.mrb[79].mxu1 }
 0x41a   :  { %v4198_v17 = vadd.f32 %v4805_v8, %v6300_v43  ;;  %v4808_v6 = vadd.f32 %v4807_v22, %v4806_v7  ;;  %4269 = vadd.xlane.f32.xlu1 %v4240_v12 }
 0x41c   :  { %v4218_v21 = vmax.f32 %v4198_v17, 0.0  ;;  %v4201_v39 = vadd.f32 %v4808_v6, %v6300_v43  ;;  %v6346_v43 = vand.u32 127, %v353_v41 }
 0x41e   :  { %v4219_v10 = vmax.f32 %v4201_v39, 0.0  ;;  %v4241_v60 = vmul.f32 %v6306_v9, %v4218_v21  ;;  %v4347_v45 = vadd.s32 4294967288, %v6346_v43  ;;  %v4354_v30 = vadd.s32 4294967280, %v6346_v43 }
 0x41f   :  { %v4361_v41 = vadd.s32 4294967272, %v6346_v43  ;;  %v4345_v44 = vsub.s32 %v6346_v43, %v5870_v48  ;;  %v4368_v54 = vadd.s32 4294967264, %v6346_v43  ;;  %v4375_v36 = vadd.s32 4294967256, %v6346_v43 }
 0x420   :  { %4271 = vadd.xlane.f32.xlu0 %v4241_v60  ;;  %v4242_v40 = vmul.f32 %v6306_v9, %v4219_v10  ;;  %v4350_v58 = vsub.s32 %v4347_v45, %v5870_v48  ;;  %v4357_v37 = vsub.s32 %v4354_v30, %v5870_v48  ;;  %v4382_v13 = vadd.s32 4294967248, %v6346_v43 }
 0x421   :  { %v4364_v47 = vsub.s32 %v4361_v41, %v5870_v48  ;;  %v4371_v28 = vsub.s32 %v4368_v54, %v5870_v48  ;;  %v4389_v52 = vadd.s32 4294967240, %v6346_v43  ;;  %v4378_v1 = vsub.s32 %v4375_v36, %v5870_v48 }
 0x422   :  { %4273 = vadd.xlane.f32.xlu1 %v4242_v40  ;;  %v4385_v3 = vsub.s32 %v4382_v13, %v5870_v48  ;;  %v4396_v4 = vadd.s32 4294967232, %v6346_v43  ;;  %v4431_v13 = vadd.s32 4294967192, %v6346_v43 }
 0x423   :  { %v4392_v40 = vsub.s32 %v4389_v52, %v5870_v48 }
 0x475   :  { %v4244_v15 = vpop.xlane.xlu0 %4243 }
 0x476   :  { %v4277_v2 = vadd.f32 %v6342_v23, %v4244_v15 }
 0x478   :  { %v4293_v27 = vmax.f32 %v4277_v2, 0.0 }
 0x479   :  { %v4246_v19 = vpop.xlane.xlu0 %4245 }
 0x47a   :  { %v4278_v35 = vadd.f32 %v6342_v23, %v4246_v19  ;;  %v4309_v50 = vmin.f32 %v4293_v27, 1.0  ;;  %v4399_v19 = vsub.s32 %v4396_v4, %v5870_v48 }
 0x47c   :  { %v4294_v25 = vmax.f32 %v4278_v35, 0.0  ;;  %v4346_v49 = vrot.slane %v4309_v50, %v4345_v44  ;;  %v4403_v35 = vadd.s32 4294967224, %v6346_v43 }
 0x47d   :  { %v4248_v34 = vpop.xlane.xlu1 %4247 }
 0x47e   :  { %v4279_v20 = vadd.f32 %v6342_v23, %v4248_v34  ;;  %v4310_v59 = vmin.f32 %v4294_v25, 1.0  ;;  %v4406_v27 = vsub.s32 %v4403_v35, %v5870_v48 }
 0x480   :  { %v4295_v11 = vmax.f32 %v4279_v20, 0.0  ;;  %v4351_v63 = vrot.slane %v4310_v59, %v4350_v58 }
 0x481   :  { %v4250_v57 = vpop.xlane.xlu1 %4249 }
 0x482   :  { %v4280_v61 = vadd.f32 %v6342_v23, %v4250_v57  ;;  %v4311_v53 = vmin.f32 %v4295_v11, 1.0  ;;  %v4353_v8 = vsel %vm4352_vm0, %v4351_v63, %v4346_v49  ;;  %v4410_v57 = vadd.s32 4294967216, %v6346_v43 }
 0x483   :  { %v4417_v11 = vadd.s32 4294967208, %v6346_v43 }
 0x484   :  { %v4296_v33 = vmax.f32 %v4280_v61, 0.0  ;;  %v4358_v51 = vrot.slane %v4311_v53, %v4357_v37  ;;  %v4413_v30 = vsub.s32 %v4410_v57, %v5870_v48 }
 0x485   :  { %v4252_v9 = vpop.xlane.xlu0 %4251  ;;  %v4420_v50 = vsub.s32 %v4417_v11, %v5870_v48 }
 0x486   :  { %v4281_v42 = vadd.f32 %v6342_v23, %v4252_v9  ;;  %v4312_v24 = vmin.f32 %v4296_v33, 1.0  ;;  %v4360_v60 = vsel %vm4359_vm1, %v4358_v51, %v4353_v8 }
 0x487   :  { %v4254_v26 = vpop.xlane.xlu1 %4253 }
 0x488   :  { %v4282_v5 = vadd.f32 %v6342_v23, %v4254_v26  ;;  %v4297_v62 = vmax.f32 %v4281_v42, 0.0  ;;  %v4365_v55 = vrot.slane %v4312_v24, %v4364_v47 }
 0x48a   :  { %v4298_v18 = vmax.f32 %v4282_v5, 0.0  ;;  %v4313_v14 = vmin.f32 %v4297_v62, 1.0  ;;  %v4367_v34 = vsel %vm4366_vm2, %v4365_v55, %v4360_v60 }
 0x48c   :  { %v4314_v7 = vmin.f32 %v4298_v18, 1.0  ;;  %v4372_v6 = vrot.slane %v4313_v14, %v4371_v28  ;;  %v4438_v14 = vadd.s32 4294967184, %v6346_v43 }
 0x48d   :  { %v4256_v29 = vpop.xlane.xlu0 %4255 }
 0x48e   :  { %v4283_v31 = vadd.f32 %v6342_v23, %v4256_v29  ;;  %v4379_v2 = vrot.slane %v4314_v7, %v4378_v1  ;;  %v4374_v45 = vsel %vm4373_vm3, %v4372_v6, %v4367_v34  ;;  %v4424_v29 = vadd.s32 4294967200, %v6346_v43 }
 0x48f   :  { %v4258_v32 = vpop.xlane.xlu1 %4257  ;;  %v4441_v8 = vsub.s32 %v4438_v14, %v5870_v48 }
 0x490   :  { %v4284_v0 = vadd.f32 %v6342_v23, %v4258_v32  ;;  %v4299_v38 = vmax.f32 %v4283_v31, 0.0  ;;  %v4381_v41 = vsel %vm4380_vm4, %v4379_v2, %v4374_v45  ;;  %v4427_v37 = vsub.s32 %v4424_v29, %v5870_v48 }
 0x492   :  { %v4300_v12 = vmax.f32 %v4284_v0, 0.0  ;;  %v4315_v21 = vmin.f32 %v4299_v38, 1.0 }
 0x494   :  { %v4316_v20 = vmin.f32 %v4300_v12, 1.0  ;;  %v4386_v25 = vrot.slane %v4315_v21, %v4385_v3  ;;  %v4445_v3 = vadd.s32 4294967176, %v6346_v43 }
 0x495   :  { %v4260_v16 = vpop.xlane.xlu0 %4259 }
 0x496   :  { %v4285_v56 = vadd.f32 %v6342_v23, %v4260_v16  ;;  %v4393_v33 = vrot.slane %v4316_v20, %v4392_v40  ;;  %v4388_v44 = vsel %vm4387_vm5, %v4386_v25, %v4381_v41 }
 0x497   :  { %v4262_v46 = vpop.xlane.xlu1 %4261 }
 0x498   :  { %v4286_v22 = vadd.f32 %v6342_v23, %v4262_v46  ;;  %v4301_v39 = vmax.f32 %v4285_v56, 0.0  ;;  %v4395_v47 = vsel %vm4394_vm6, %v4393_v33, %v4388_v44  ;;  %v4434_v46 = vsub.s32 %v4431_v13, %v5870_v48 }
 0x49a   :  { %v4302_v9 = vmax.f32 %v4286_v22, 0.0  ;;  %v4317_v42 = vmin.f32 %v4301_v39, 1.0  ;;  %v4448_v39 = vsub.s32 %v4445_v3, %v5870_v48 }
 0x49c   :  { %v4318_v58 = vmin.f32 %v4302_v9, 1.0  ;;  %v4400_v54 = vrot.slane %v4317_v42, %v4399_v19 }
 0x49d   :  { %v4264_v17 = vpop.xlane.xlu0 %4263 }
 0x49e   :  { %v4287_v10 = vadd.f32 %v6342_v23, %v4264_v17  ;;  %v4407_v24 = vrot.slane %v4318_v58, %v4406_v27  ;;  %v4402_v63 = vsel %vm4401_vm7, %v4400_v54, %v4395_v47 }
 0x49f   :  { %v4266_v15 = vpop.xlane.xlu1 %4265 }
 0x4a0   :  { %v4288_v61 = vadd.f32 %v6342_v23, %v4266_v15  ;;  %v4303_v26 = vmax.f32 %v4287_v10, 0.0  ;;  %v4409_v38 = vsel %vm4408_vm8, %v4407_v24, %v4402_v63 }
 0x4a2   :  { %v4304_v59 = vmax.f32 %v4288_v61, 0.0  ;;  %v4319_v62 = vmin.f32 %v4303_v26, 1.0 }
 0x4a4   :  { %v4320_v36 = vmin.f32 %v4304_v59, 1.0  ;;  %v4414_v18 = vrot.slane %v4319_v62, %v4413_v30 }
 0x4a5   :  { %v4268_v5 = vpop.xlane.xlu0 %4267 }
 0x4a6   :  { %v4289_v31 = vadd.f32 %v6342_v23, %v4268_v5  ;;  %v4421_v56 = vrot.slane %v4320_v36, %v4420_v50  ;;  %v4416_v52 = vsel %vm4415_vm9, %v4414_v18, %v4409_v38 }
 0x4a7   :  { %v4270_v32 = vpop.xlane.xlu1 %4269 }
 0x4a8   :  { %v4305_v53 = vmax.f32 %v4289_v31, 0.0  ;;  %v4290_v16 = vadd.f32 %v6342_v23, %v4270_v32  ;;  %v4423_v22 = vsel %vm4422_vm10, %v4421_v56, %v4416_v52 }
 0x4aa   :  { %v4321_v0 = vmin.f32 %v4305_v53, 1.0  ;;  %v4306_v28 = vmax.f32 %v4290_v16, 0.0 }
 0x4ac   :  { %v4322_v49 = vmin.f32 %v4306_v28, 1.0  ;;  %v4428_v55 = vrot.slane %v4321_v0, %v4427_v37 }
 0x4ad   :  { %v4272_v51 = vpop.xlane.xlu0 %4271 }
 0x4ae   :  { %v4291_v1 = vadd.f32 %v6342_v23, %v4272_v51  ;;  %v4435_v17 = vrot.slane %v4322_v49, %v4434_v46  ;;  %v4430_v6 = vsel %vm4429_vm11, %v4428_v55, %v4423_v22 }
 0x4af   :  { %v4274_v4 = vpop.xlane.xlu1 %4273 }
 0x4b0   :  { %v4307_v7 = vmax.f32 %v4291_v1, 0.0  ;;  %v4292_v12 = vadd.f32 %v6342_v23, %v4274_v4  ;;  %v4437_v43 = vsel %vm4436_vm12, %v4435_v17, %v4430_v6 }
 0x4b2   :  { %v4323_v21 = vmin.f32 %v4307_v7, 1.0  ;;  %v4308_v10 = vmax.f32 %v4292_v12, 0.0 }
 0x4b4   :  { %v4442_v60 = vrot.slane %v4323_v21, %v4441_v8  ;;  %v4324_v40 = vmin.f32 %v4308_v10, 1.0 }
 0x4b6   :  { %v4449_v15 = vrot.slane %v4324_v40, %v4448_v39  ;;  %v4444_v34 = vsel %vm4443_vm13, %v4442_v60, %v4437_v43 }
 0x4b8   :  { %v4451_v23 = vsel %vm4450_vm14, %v4449_v15, %v4444_v34 }
 0x4b9   :  { %4453 = vst [vmem:[#allocation11] sm:$0x1] %v4451_v23 }
 0x4ba   :  { %5738 = shalt.err (!%p5735_p8)
}
 0x4bb   :  { %s5739_s29 = scalar_lea.hbm %s6423_s9, 16 }
 0x4bc   :  { %p5740_p9 = scmp.ne.s32.totalorder %s6423_s9, %s5739_s29  ;;  %p5743_p10 = scmp.lt.u32.totalorder %s5739_s29, %s6423_s9 }
 0x4be   :  { %p5745_p11 = pnand %p5743_p10, %p5740_p9 }
 0x4c0   :  { %5748 = shalt.err (!%p5745_p11)
}
 0x4c1   :  { %4463 = dma.vmem_to_hbm [thread:$0]  %s4461_s26, 16, %s6423_s9, [#allocation5]  }
 0x4c2   :  { %5755 = dma.done.wait [#allocation5], 16  }
 0x4c3   :  { %5756 = vsyncadd [#allocation5], 4294967280 }
 0x4c4   :  { %4467 = vsyncpa [#allocation4], 1 }
 0x4c5   :  { %4468 = vsyncpa [#allocation7], 1 }
 0x4c6   :  { %4469 = vsyncpa [#allocation10], 1 }
 0x4c7   :  { %4470 = vsyncpa [#allocation5], 1 }

</bundles_post_ra>
